<compile_context>
chip_gen: v7x
topology: tpu7x:2x2x1
jax: 0.10.0
libtpu: 0.0.40
codegen_flags: <defaults>
</compile_context>

<pallas_src>
import jax
import jax.numpy as jnp
from jax.experimental import pallas as pl
from jax.experimental.pallas import tpu as pltpu


def _randconv_kernel(gb_ref, xw_ref, m_ref, o_ref):
    # gb_ref: SMEM (2,) f32                [gamma, beta]
    # xw_ref: (1, C_out, KK*HW_in) bf16    per-tap (w_k @ x) stacked along contraction
    # m_ref:  (1, KK*HW_in, HW_out) bf16   dense bilinear sampling operator (tap-major rows)
    # o_ref:  (1, C_out, HW_out) f32
    xw = xw_ref[0]                               # (C_out, KK*HW_in) bf16
    m = m_ref[0]                                 # (KK*HW_in, HW_out) bf16
    # single long-contraction MXU matmul, f32 accumulate
    acc = jax.lax.dot_general(xw, m, (((1,), (0,)), ((), ())),
                              preferred_element_type=jnp.float32)  # (C_out, HW_out)

    hw = acc.shape[1]
    denom = float(hw - 1) if hw > 1 else 1.0     # unbiased std (torch default), HW==1 safe
    mean = jnp.mean(acc, axis=1, keepdims=True)
    centered = acc - mean
    var = jnp.sum(centered * centered, axis=1, keepdims=True) * (1.0 / denom)
    std = jnp.sqrt(var)

    gamma = gb_ref[0]
    beta = gb_ref[1]
    # EUP reciprocal (separate VLIW slot); fold gamma into the per-row scale.
    scale = gamma * pl.reciprocal(std + 1e-8, approx=True)   # (C_out, 1)
    o_ref[0] = jnp.tanh(centered * scale + beta)


def rand_conv_block(x_flat, weight_taps, M, gamma_beta):
    """x_flat: (B, C_in, HW_in) bf16, weight_taps: (KK, C_out, C_in) f32,
    M: (B, KK, HW_in, HW_out) bf16, gamma_beta: (2,) f32.
    Returns (B, C_out, HW_out) float32."""
    B, C_in, HW_in = x_flat.shape
    KK, C_out, _ = weight_taps.shape
    HW_out = M.shape[3]
    K_red = KK * HW_in

    # Tiny wrapper-side precompute (B*KK*C_out*C_in*HW_in MACs):
    # xw[b] = concat_k(w_k @ x[b])  -> (B, C_out, KK*HW_in), stored bf16.
    hp = jax.lax.Precision.HIGHEST
    xw = jnp.einsum('koc,bci->boki', weight_taps,
                    x_flat.astype(jnp.float32), precision=hp)
    xw = xw.reshape(B, C_out, K_red).astype(jnp.bfloat16)
    M2 = M.reshape(B, K_red, HW_out)             # bf16, tap-major contraction rows

    cost = pl.CostEstimate(
        flops=2 * B * C_out * K_red * HW_out,
        transcendentals=B * C_out * HW_out,
        bytes_accessed=int(M2.size * M2.dtype.itemsize
                           + xw.size * xw.dtype.itemsize
                           + B * C_out * HW_out * 4))

    return pl.pallas_call(
        _randconv_kernel,
        out_shape=jax.ShapeDtypeStruct((B, C_out, HW_out), jnp.float32),
        grid=(B,),
        in_specs=[
            pl.BlockSpec(memory_space=pltpu.MemorySpace.SMEM),       # gamma/beta
            pl.BlockSpec((1, C_out, K_red), lambda b: (b, 0, 0)),    # xw[b]
            pl.BlockSpec((1, K_red, HW_out), lambda b: (b, 0, 0)),   # M[b] (1.18 MB bf16)
        ],
        out_specs=pl.BlockSpec((1, C_out, HW_out), lambda b: (b, 0, 0)),
        compiler_params=pltpu.CompilerParams(
            dimension_semantics=("parallel",)),
        cost_estimate=cost,
    )(gamma_beta, xw, M2)


def build_sampling_matrix(offsets, K, H_in, W_in, H_out, W_out,
                          stride, pad, dil):
    """Dense bilinear sampling operator M[b, k, hw_in, hw_out] matching
    torchvision deform_conv2d (offset channel layout (dy, dx) per tap,
    zero padding outside the input).  Input-major rows so the kernel can do
    xw @ M directly (no transpose)."""
    B = offsets.shape[0]
    KK = K * K
    off = offsets.reshape(B, KK, 2, H_out, W_out)
    dy, dx = off[:, :, 0], off[:, :, 1]                    # (B, KK, H_out, W_out)
    ki = jnp.arange(K)
    k_i = jnp.repeat(ki, K)                                # tap row index i
    k_j = jnp.tile(ki, K)                                  # tap col index j
    hs = jnp.arange(H_out)
    ws = jnp.arange(W_out)
    base_y = (hs[None, :, None] * stride - pad + k_i[:, None, None] * dil)
    base_x = (ws[None, None, :] * stride - pad + k_j[:, None, None] * dil)
    py = base_y[None].astype(jnp.float32) + dy             # (B, KK, H_out, W_out)
    px = base_x[None].astype(jnp.float32) + dx
    y0 = jnp.floor(py)
    x0 = jnp.floor(px)
    ly = py - y0
    lx = px - x0
    y0i = y0.astype(jnp.int32)
    x0i = x0.astype(jnp.int32)
    HWo, HWi = H_out * W_out, H_in * W_in
    M = jnp.zeros((B, KK, HWo, HWi), jnp.float32)
    corners = [
        (y0i,     x0i,     (1.0 - ly) * (1.0 - lx)),
        (y0i,     x0i + 1, (1.0 - ly) * lx),
        (y0i + 1, x0i,     ly * (1.0 - lx)),
        (y0i + 1, x0i + 1, ly * lx),
    ]
    for yy, xx, wgt in corners:
        valid = ((yy >= 0) & (yy < H_in) & (xx >= 0) & (xx < W_in))
        flat = (jnp.clip(yy, 0, H_in - 1) * W_in +
                jnp.clip(xx, 0, W_in - 1)).reshape(B, KK, HWo)
        oh = jax.nn.one_hot(flat, HWi, dtype=jnp.float32)
        coef = (wgt * valid.astype(jnp.float32)).reshape(B, KK, HWo, 1)
        M = M + coef * oh
    return jnp.swapaxes(M, 2, 3)                           # (B, KK, HWi, HWo)


if __name__ == "__main__":
    # Small shapes consistent with the module (input_dim=16, K=3, pad=1 ⇒
    # output spatial == input spatial, as required by the offset tensor).
    B, C_in, C_out, K, H = 2, 4, 4, 3, 16
    stride, pad, dil = 1, 1, 1
    H_out = (H + 2 * pad - dil * (K - 1) - 1) // stride + 1
    KK = K * K

    key = jax.random.PRNGKey(0)
    kw, kg, kb, ksg, kov, koff, kx = jax.random.split(key, 7)

    # --- deterministic parameter init (mirrors __init__) ---
    sigma_w = 1.0 / (K * K * C_in) ** 0.5
    weight = jax.random.normal(kw, (C_out, C_in, K, K), jnp.float32) * sigma_w
    gamma = jax.random.normal(kg, (), jnp.float32) * 0.25
    beta = jax.random.normal(kb, (), jnp.float32) * 0.25
    sigma_g = jax.random.uniform(ksg, (), jnp.float32, 0.01, 1.0)
    ii = jnp.arange(K, dtype=jnp.float32)
    gauss = jnp.exp(-(((ii[None, :] - 1.0) ** 2) + ((ii[:, None] - 1.0) ** 2))
                    / (2.0 * sigma_g ** 2))
    weight = weight * gauss                                   # gaussian-masked weight
    off_std = jax.random.uniform(kov, (), jnp.float32, 0.01, 0.2) ** 2
    offsets = jax.random.normal(koff, (B, 2 * KK, H_out, H_out),
                                jnp.float32) * off_std        # fixed offset "param"

    # --- example input (NCHW, like PyTorch) ---
    x = jax.random.normal(kx, (B, C_in, H, H), jnp.float32)

    # --- glue: sampling operator (bf16), tap-major weights, flattened x ---
    M = build_sampling_matrix(offsets, K, H, H, H_out, H_out, stride, pad, dil)
    M_bf16 = M.astype(jnp.bfloat16)
    w_taps = jnp.transpose(weight.reshape(C_out, C_in, KK), (2, 0, 1))
    x_flat = x.reshape(B, C_in, H * H)
    x_bf16 = x_flat.astype(jnp.bfloat16)
    gamma_beta = jnp.stack([gamma, beta]).astype(jnp.float32)

    out = rand_conv_block(x_bf16, w_taps, M_bf16, gamma_beta)
    out = jax.block_until_ready(out).reshape(B, C_out, H_out, H_out)

    # pure-JAX reference using the same bf16 operands / precompute path
    hp = jax.lax.Precision.HIGHEST
    xw_ref = jnp.einsum('koc,bci->boki', w_taps,
                        x_bf16.astype(jnp.float32), precision=hp)
    xw_ref = xw_ref.reshape(B, C_out, KK * H * H).astype(jnp.bfloat16)
    Mr = M_bf16.reshape(B, KK * H * H, H_out * H_out).astype(jnp.float32)
    ref = jnp.einsum('bok,bkq->boq', xw_ref.astype(jnp.float32), Mr, precision=hp)
    mean = ref.mean(axis=2, keepdims=True)
    std = jnp.sqrt(((ref - mean) ** 2).sum(axis=2, keepdims=True)
                   / (H_out * H_out - 1))
    ref = jnp.tanh((ref - mean) / (std + 1e-8) * gamma + beta)
    ref = ref.reshape(B, C_out, H_out, H_out)

    assert out.shape == (B, C_out, H_out, H_out)
    err = float(jnp.max(jnp.abs(out - ref)))
    assert err < 1e-2, err
    print("KERNEL_OK")
</pallas_src>

<mosaic_0001>
module attributes {stable_mosaic.version = 11 : i64} {
  func.func @_randconv_kernel(%arg0: i32, %arg1: memref<2xf32, #tpu.memory_space<smem>>, %arg2: memref<1x4x2304xbf16, #tpu.memory_space<vmem>>, %arg3: memref<1x2304x256xbf16, #tpu.memory_space<vmem>>, %arg4: memref<1x4x256xf32, #tpu.memory_space<vmem>>) attributes {dimension_semantics = [#tpu.dimension_semantics<parallel>], iteration_bounds = array<i64: 2>, scalar_prefetch = 0 : i64, scratch_operands = 0 : i64, tpu.core_type = #tpu.core_type<tc>, window_params = [{transform_indices = @transform_0, window_bounds = array<i64: 2>}, {transform_indices = @transform_1, window_bounds = array<i64: 1, 4, 2304>}, {transform_indices = @transform_2, window_bounds = array<i64: 1, 2304, 256>}, {transform_indices = @transform_3, window_bounds = array<i64: 1, 4, 256>}]} {
    %c0 = arith.constant 0 : index
    %c0_0 = arith.constant 0 : index
    %c0_1 = arith.constant 0 : index
    %0 = vector.load %arg2[%c0, %c0_0, %c0_1] : memref<1x4x2304xbf16, #tpu.memory_space<vmem>>, vector<1x4x2304xbf16>
    %1 = vector.shape_cast %0 : vector<1x4x2304xbf16> to vector<4x2304xbf16>
    %c0_2 = arith.constant 0 : index
    %c0_3 = arith.constant 0 : index
    %c0_4 = arith.constant 0 : index
    %2 = vector.load %arg3[%c0_2, %c0_3, %c0_4] : memref<1x2304x256xbf16, #tpu.memory_space<vmem>>, vector<1x2304x256xbf16>
    %3 = vector.shape_cast %2 : vector<1x2304x256xbf16> to vector<2304x256xbf16>
    %cst = arith.constant dense<0.000000e+00> : vector<4x256xf32>
    %4 = tpu.matmul %1, %3, %cst {dimension_numbers = #tpu.dot_dimension_numbers<[1], [0], [0], [1], [0, 0, 1, 1], [], []>} : vector<4x2304xbf16>, vector<2304x256xbf16>, vector<4x256xf32> -> vector<4x256xf32>
    %cst_5 = arith.constant dense<0.000000e+00> : vector<4xf32>
    %5 = vector.multi_reduction <add>, %4, %cst_5 [1] : vector<4x256xf32> to vector<4xf32>
    %6 = vector.shape_cast %5 : vector<4xf32> to vector<4x1xf32>
    %cst_6 = arith.constant 2.560000e+02 : f32
    %7 = vector.broadcast %cst_6 : f32 to vector<4x1xf32>
    %8 = arith.divf %6, %7 : vector<4x1xf32>
    %9 = vector.broadcast %8 : vector<4x1xf32> to vector<4x256xf32>
    %10 = arith.subf %4, %9 : vector<4x256xf32>
    %11 = arith.mulf %10, %10 : vector<4x256xf32>
    %cst_7 = arith.constant dense<0.000000e+00> : vector<4xf32>
    %12 = vector.multi_reduction <add>, %11, %cst_7 [1] : vector<4x256xf32> to vector<4xf32>
    %13 = vector.shape_cast %12 : vector<4xf32> to vector<4x1xf32>
    %cst_8 = arith.constant 0.00392156886 : f32
    %14 = vector.broadcast %cst_8 : f32 to vector<4x1xf32>
    %15 = arith.mulf %13, %14 : vector<4x1xf32>
    %16 = math.sqrt %15 : vector<4x1xf32>
    %c0_9 = arith.constant 0 : index
    %17 = memref.load %arg1[%c0_9] : memref<2xf32, #tpu.memory_space<smem>>
    %c1 = arith.constant 1 : index
    %18 = memref.load %arg1[%c1] : memref<2xf32, #tpu.memory_space<smem>>
    %cst_10 = arith.constant 9.99999993E-9 : f32
    %19 = vector.broadcast %cst_10 : f32 to vector<4x1xf32>
    %20 = arith.addf %16, %19 : vector<4x1xf32>
    %21 = tpu.reciprocal %20 {approx = true} : vector<4x1xf32> -> vector<4x1xf32>
    %22 = vector.broadcast %17 : f32 to vector<4x1xf32>
    %23 = arith.mulf %22, %21 : vector<4x1xf32>
    %24 = vector.broadcast %23 : vector<4x1xf32> to vector<4x256xf32>
    %25 = arith.mulf %10, %24 : vector<4x256xf32>
    %26 = vector.broadcast %18 : f32 to vector<4x256xf32>
    %27 = arith.addf %25, %26 : vector<4x256xf32>
    %28 = math.tanh %27 : vector<4x256xf32>
    %c0_11 = arith.constant 0 : index
    %c0_12 = arith.constant 0 : index
    %c0_13 = arith.constant 0 : index
    %29 = vector.load %arg4[%c0_11, %c0_12, %c0_13] : memref<1x4x256xf32, #tpu.memory_space<vmem>>, vector<1x4x256xf32>
    %30 = vector.shape_cast %29 : vector<1x4x256xf32> to vector<4x256xf32>
    %31 = vector.shape_cast %28 : vector<4x256xf32> to vector<1x4x256xf32>
    tpu.vector_store %arg4[%c0_11, %c0_12, %c0_13], %31 {strides = array<i32>} : memref<1x4x256xf32, #tpu.memory_space<vmem>>, vector<1x4x256xf32>,
    return
  }
  func.func @transform_0(%arg0: i32) -> i32 {
    %c0_i32 = arith.constant 0 : i32
    %c0_i32_0 = arith.constant 0 : i32
    return %c0_i32 : i32
  }
  func.func @transform_1(%arg0: i32) -> (i32, i32, i32) {
    %c0_i32 = arith.constant 0 : i32
    %c0_i32_0 = arith.constant 0 : i32
    %c0_i32_1 = arith.constant 0 : i32
    return %arg0, %c0_i32, %c0_i32_0 : i32, i32, i32
  }
  func.func @transform_2(%arg0: i32) -> (i32, i32, i32) {
    %c0_i32 = arith.constant 0 : i32
    %c0_i32_0 = arith.constant 0 : i32
    %c0_i32_1 = arith.constant 0 : i32
    return %arg0, %c0_i32, %c0_i32_0 : i32, i32, i32
  }
  func.func @transform_3(%arg0: i32) -> (i32, i32, i32) {
    %c0_i32 = arith.constant 0 : i32
    %c0_i32_0 = arith.constant 0 : i32
    %c0_i32_1 = arith.constant 0 : i32
    return %arg0, %c0_i32, %c0_i32_0 : i32, i32, i32
  }
}

</mosaic_0001>

<bundles_post_ra>
// kernel: tpu_custom_call.1
= control target key start
LH: loop header
LB: loop body
LE: loop exit
PB: predicated region body
PF: predicated region fallthrough
CT: control target
= control target key end

     0   :  { %8 = vsyncpa [#allocation5], 0  ;;  %s4216_s0 = inlined_call_operand.hbm [shape: f32[2], index: 0, kind: input, shape index: {}]   ;;  %s4217_s1 = inlined_call_operand.hbm [shape: bf16[2,4,2304], index: 1, kind: input, shape index: {}]   ;;  %s4218_s2 = inlined_call_operand.hbm [shape: bf16[2,2304,256], index: 2, kind: input, shape index: {}]   ;;  %s4219_s3 = inlined_call_operand.hbm [shape: f32[2,4,256], index: 3, kind: output, shape index: {}]  }
   0x1   :  { %9 = vsyncpa [#allocation3], 0 }
   0x2   :  { %11 = vsyncpa [#allocation3 + $0x1], 0 }
   0x3   :  { %12 = vsyncpa [#allocation8], 0 }
   0x4   :  { %14 = vsyncpa [#allocation8 + $0x1], 0 }
   0x5   :  { %15 = vsyncpa [#allocation4], 0 }
   0x6   :  { %17 = vsyncpa [#allocation4 + $0x1], 0  ;;  %s3629_s12 = smov 0   ;;  %s3631_s13 = smov 0  }
   0x7   :  { %s3633_s14 = smov 0   ;;  %s3635_s15 = smov 0  }
   0x8 LB: > { %s3650_s16 = sadd.s32 4294967295, %s3600_s15   ;;  %s2603_s17 = sadd.s32 4294967294, %s3600_s15   ;;  %s3600_s15 = sphi %s3635_s15, %s4238_s15   ;;  %s3596_s14 = sphi %s3633_s14, %s4237_s14   ;;  %s3592_s13 = sphi %s3631_s13, %s4236_s13   ;;  %s3588_s12 = sphi %s3629_s12, %s4235_s12  }
   0x9   : > { %s3654_s18 = sadd.s32 1, %s3600_s15   ;;  %s51_s19 = sadd.s32 1, %s3596_s14 }
   0xa   : > { %s48_s20 = ssub.s32 %s3600_s15, %s3654_s18  ;;  %p58_p0 = scmp.ne.s32.totalorder %s3596_s14, %s3592_s13 }
   0xb   : > { %p49_p1 = scmp.eq.s32.totalorder %s48_s20, 0  ;;  %p64_p2 = scmp.ne.s32.totalorder %s3592_s13, %s3588_s12 }
   0xc   : > { %p4220_p3 = scmp.eq.s32.totalorder %s3650_s16, 0  ;;  %p114_p4 = scmp.eq.s32.totalorder %s3650_s16, 1 }
   0xd   : > { %s3666_s21 = scalar_select %p49_p1, %s3596_s14, %s51_s19  }
   0xe   : > { %p3670_p5 = por %p4220_p3, %p64_p2  ;;  %p3677_p6 = por %p114_p4, %p58_p0 }
   0xf   : > { %p120_p7 = scmp.eq.s32.totalorder %s2603_s17, 1  ;;  %p2604_p8 = scmp.ge.s32.totalorder %s3600_s15, 1 }
  0x10   : > { %s4223_s22 = scalar_select %p3670_p5, 1, 0 }
  0x11   : > { %s4224_s23 = scalar_select %p3677_p6, 1, 0 }
  0x12   : > { %p127_p9 = scmp.lt.s32.totalorder %s3600_s15, 3  ;;  %p3683_p10 = por %p120_p7, %p64_p2 }
  0x13   : > { %p59_p13 = scmp.eq.s32.totalorder %s3600_s15, 0  ;;  %p2970_p1 = scmp.lt.s32.totalorder %s3600_s15, 2 }
  0x14   : > { %s4225_s24 = scalar_select %p3683_p10, 1, 0 }
  0x15   : > { %p3687_p11 = pnand %p2604_p8, %p127_p9  ;;  %s3697_s26 = sand.u32 1, %s3596_s14  }
  0x16   : > { %p60_p3 = por %p59_p13, %p58_p0  ;;  %p4227_p6 = scmp.eq.s32.totalorder %s3650_s16, 0 }
  0x17   : > { %p2954_p4 = pneg %p3687_p11  ;;  %s2938_s27 = smul.u32 36, %s3697_s26 }
  0x18   : > { %s2939_s28 = smul.u32 576, %s3600_s15  ;;  %p3706_p7 = pnand %p2970_p1, %p60_p3 }
  0x19   : > { %p2955_p2 = pnand %p2954_p4, %p4227_p6  ;;  %s3453_s5 = scalar_lea.hbm %s4216_s0, 16 }
  0x1a   : > { %p3454_p8 = scmp.ne.s32.totalorder %s4216_s0, %s3453_s5  ;;  %p3460_p0 = scmp.lt.u32.totalorder %s3453_s5, %s4216_s0 }
  0x1b   : > { %p3455_p9 = pneg %p2955_p2 }
  0x1d   : > { %p3456_p12 = pnand %p3455_p9, %p3454_p8 }
  0x1f   : > { %p3457_p10 = pneg %p3456_p12 }
  0x21   : > { %p3462_p6 = pnand %p3460_p0, %p3457_p10 }
  0x23   : > { %3465 = shalt.err (!%p3462_p6)
}
  0x24   : > { %s3602_s10 = smov [#allocation2]   ;;  %s3725_s30 = scalar_lea.hbm %s4217_s1, %s2939_s28 }
  0x25   : > { %2957 = dma.hbm_to_smem (!%p2955_p2), %s4216_s0, 16, %s3602_s10, [#allocation5]  }
  0x26   : > { %s153_s4 = scalar_lea.vmem [#allocation6], %s2938_s27  ;;  %s150_s6 = scalar_lea.sflag [#allocation3], %s3697_s26 }
  0x27   : > { %s161_s5 = sshll.u32 %s153_s4, 4  ;;  %s3466_s7 = scalar_lea.hbm %s3725_s30, 576  ;;  %s3727_s5 = int_to_ptr.vmem [resolvable:$true] %s161_s5 }
  0x28   : > { %p3467_p3 = scmp.ne.s32.totalorder %s3725_s30, %s3466_s7  ;;  %p3468_p10 = pneg %p3706_p7 }
  0x29   : > { %s3471_s9 = scalar_lea.hbm %s4217_s1, 1152  ;;  %p3472_p1 = scmp.lt.u32.totalorder %s3725_s30, %s4217_s1 }
  0x2a   : > { %p3469_p12 = pnand %p3468_p10, %p3467_p3  ;;  %p3473_p4 = scmp.lt.u32.totalorder %s3471_s9, %s3466_s7 }
  0x2b   : > { %p3475_p8 = scmp.lt.u32.totalorder %s3466_s7, %s3725_s30 }
  0x2c   : > { %p3470_p13 = pneg %p3469_p12  ;;  %p3474_p2 = por %p3473_p4, %p3472_p1 }
  0x2e   : > { %p3476_p9 = por %p3475_p8, %p3474_p2 }
  0x30   : > { %p3477_p0 = pnand %p3476_p9, %p3470_p13 }
  0x32   : > { %3480 = shalt.err (!%p3477_p0)
}
  0x33   : > { %s3481_s27 = scalar_lea.vmem %s3727_s5, 576  ;;  %s3603_s17 = smov [#allocation6]  }
  0x34   : > { %p3482_p6 = scmp.ne.s32.totalorder %s3727_s5, %s3481_s27  ;;  %s3486_s19 = sshll.u32 %s3603_s17, 4  ;;  %s3487_s19 = int_to_ptr.vmem [resolvable:$false] %s3486_s19 }
  0x35   : > { %s3488_s20 = scalar_lea.vmem %s3487_s19, 1152  ;;  %p3489_p5 = scmp.lt.s32.totalorder %s3727_s5, %s3487_s19 }
  0x36   : > { %p3484_p3 = pnand %p3482_p6, %p3468_p10  ;;  %p3490_p1 = scmp.lt.s32.totalorder %s3488_s20, %s3481_s27 }
  0x38   : > { %p3485_p12 = pneg %p3484_p3  ;;  %p3491_p4 = por %p3490_p1, %p3489_p5 }
  0x3a   : > { %p3492_p2 = pnand %p3491_p4, %p3485_p12 }
  0x3c   : > { %3495 = shalt.err (!%p3492_p2)
}
  0x3d   : > { %2961 = dma.hbm_to_vmem [thread:$0]  (!%p3706_p7), %s3725_s30, 576, %s3727_s5, %s150_s6  }
  0x3e   : > { %s2940_s4 = smul.u32 2304, %s3697_s26  ;;  %s169_s27 = scalar_lea.sflag [#allocation8], %s3697_s26 }
  0x3f   : > { %s2941_s7 = smul.u32 36864, %s3600_s15  ;;  %s3501_s6 = scalar_lea.hbm %s4218_s2, 73728 }
  0x40   : > { %s172_s10 = scalar_lea.vmem [#allocation7], %s2940_s4 }
  0x41   : > { %s3760_s9 = scalar_lea.hbm %s4218_s2, %s2941_s7  ;;  %s179_s11 = sshll.u32 %s172_s10, 4  ;;  %s3762_s11 = int_to_ptr.vmem [resolvable:$true] %s179_s11 }
  0x42   : > { %s3496_s17 = scalar_lea.hbm %s3760_s9, 36864  ;;  %p3502_p9 = scmp.lt.u32.totalorder %s3760_s9, %s4218_s2 }
  0x43   : > { %p3497_p5 = scmp.ne.s32.totalorder %s3760_s9, %s3496_s17  ;;  %p3503_p0 = scmp.lt.u32.totalorder %s3501_s6, %s3496_s17 }
  0x44   : > { %p3505_p3 = scmp.lt.u32.totalorder %s3496_s17, %s3760_s9 }
  0x45   : > { %p3499_p13 = pnand %p3497_p5, %p3468_p10  ;;  %p3504_p6 = por %p3503_p0, %p3502_p9 }
  0x47   : > { %p3500_p8 = pneg %p3499_p13  ;;  %p3506_p12 = por %p3505_p3, %p3504_p6 }
  0x49   : > { %p3507_p1 = pnand %p3506_p12, %p3500_p8 }
  0x4b   : > { %3510 = shalt.err (!%p3507_p1)
}
  0x4c   : > { %s3511_s4 = scalar_lea.vmem %s3762_s11, 36864  ;;  %s3604_s7 = smov [#allocation7]  }
  0x4d   : > { %p3512_p4 = scmp.ne.s32.totalorder %s3762_s11, %s3511_s4  ;;  %s3516_s8 = sshll.u32 %s3604_s7, 4  ;;  %s3517_s8 = int_to_ptr.vmem [resolvable:$false] %s3516_s8 }
  0x4e   : > { %s3518_s28 = scalar_lea.vmem %s3517_s8, 73728  ;;  %p3519_p13 = scmp.lt.s32.totalorder %s3762_s11, %s3517_s8 }
  0x4f   : > { %p3514_p2 = pnand %p3512_p4, %p3468_p10  ;;  %p3520_p9 = scmp.lt.s32.totalorder %s3518_s28, %s3511_s4 }
  0x51   : > { %p3515_p5 = pneg %p3514_p2  ;;  %p3521_p0 = por %p3520_p9, %p3519_p13 }
  0x53   : > { %p3522_p6 = pnand %p3521_p0, %p3515_p5 }
  0x55   : > { %3525 = shalt.err (!%p3522_p6)
}
  0x56   : > { %s3605_s10 = smov 128   ;;  %s3606_s17 = smov 8  }
  0x57   : > { %2964 = dma.hbm_to_vmem [thread:$0]  (!%p3706_p7), %s3760_s9, 36864, %s3762_s11, %s169_s27, %s3605_s10, %s3605_s10, %s3606_s17  }
  0x58   : > { %191 = sbr.rel (%p3687_p11) target bundleno = 1004 (0x3ec), region = 32  ;;  %p4229_p10 = scmp.eq.s32.totalorder (!%p3687_p11), %s3650_s16, 0 }
  0x5f   : > { %3571 = dma.done.wait (%p4229_p10), [#allocation5], 16   ;;  %p4230_p8 = pmov %p4229_p10 }
  0x60   : > { %s3797_s30 = sand.u32 1, %s3592_s13   ;;  %p4231_p7 = scmp.ne.s32.totalorder %s4223_s22, 0 }
  0x61   : > { %3573 = vsyncadd (%p4230_p8), [#allocation5], 4294967280  ;;  %s2942_s5 = smul.u32 36, %s3797_s30  ;;  %s198_s6 = scalar_lea.sflag [#allocation3], %s3797_s30 }
  0x63   : > { %s3801_s29 = scalar_lea.vmem [#allocation6], %s2942_s5 }
  0x64   : > { %3575 = dma.done.wait (%p4231_p7), %s198_s6, 576  }
  0x65   : > { %3577 = vsyncadd (%p4231_p7), %s198_s6, 4294966720  ;;  %s2943_s25 = smul.u32 2304, %s3797_s30  ;;  %s207_s26 = scalar_lea.sflag [#allocation8], %s3797_s30 }
  0x67   : > { %s3809_s9 = scalar_lea.vmem [#allocation7], %s2943_s25 }
  0x68   : > { %3579 = dma.done.wait (%p4231_p7), %s207_s26, 36864  }
  0x69   : > { %3581 = vsyncadd (%p4231_p7), %s207_s26, 4294930432 }
  0x6a   : > { %215 = sfence }
  0x6b   : > { %v3009_v0 = vld [vmem:[%s3809_s9 + $0x4] ss:$8 sps:$4 sm:$0xff]   ;;  %v3013_v2 = vld [vmem:[%s3809_s9] ss:$8 sps:$4 sm:$0xff]   ;;  %v3015_v4 = vld [vmem:[%s3809_s9 + $0x14] ss:$8 sps:$4 sm:$0xff]   ;;  %v541_v38 = vlaneseq }
  0x6c   : > { %v3011_v1 = vld [vmem:[%s3809_s9 + $0x404] ss:$8 sps:$4 sm:$0xff]   ;;  %2071 = vmatprep.subr.bf16.mxu1 %v3009_v0  ;;  %v3014_v3 = vld [vmem:[%s3809_s9 + $0x400] ss:$8 sps:$4 sm:$0xff]   ;;  %v3017_v5 = vld [vmem:[%s3809_s9 + $0x414] ss:$8 sps:$4 sm:$0xff]  }
  0x6d   : > { %2235 = vmatprep.subr.bf16.mxu0 %v3011_v1  ;;  %2072 = vmatpush1.bf16.msra.mxu1 %v3013_v2  ;;  %v3019_v6 = vld [vmem:[%s3809_s9 + $0x10] ss:$8 sps:$4 sm:$0xff]   ;;  %v3021_v8 = vld [vmem:[%s3809_s9 + $0x24] ss:$8 sps:$4 sm:$0xff]   ;;  %v3025_v10 = vld [vmem:[%s3809_s9 + $0x20] ss:$8 sps:$4 sm:$0xff]  }
  0x6e   : > { %2236 = vmatpush1.bf16.msra.mxu0 %v3014_v3  ;;  %2073 = vmatprep.subr.bf16.mxu1 %v3015_v4  ;;  %v3020_v7 = vld [vmem:[%s3809_s9 + $0x410] ss:$8 sps:$4 sm:$0xff]   ;;  %v3023_v9 = vld [vmem:[%s3809_s9 + $0x424] ss:$8 sps:$4 sm:$0xff]   ;;  %v3026_v11 = vld [vmem:[%s3809_s9 + $0x420] ss:$8 sps:$4 sm:$0xff]  }
  0x6f   : > { %2237 = vmatprep.subr.bf16.mxu0 %v3017_v5  ;;  %v3027_v12 = vld [vmem:[%s3809_s9 + $0x34] ss:$8 sps:$4 sm:$0xff]   ;;  %v3031_v14 = vld [vmem:[%s3809_s9 + $0x30] ss:$8 sps:$4 sm:$0xff]   ;;  %v3033_v16 = vld [vmem:[%s3809_s9 + $0x44] ss:$8 sps:$4 sm:$0xff]  }
  0x70   : > { %v3029_v13 = vld [vmem:[%s3809_s9 + $0x434] ss:$8 sps:$4 sm:$0xff]   ;;  %v3032_v15 = vld [vmem:[%s3809_s9 + $0x430] ss:$8 sps:$4 sm:$0xff]   ;;  %v3035_v17 = vld [vmem:[%s3809_s9 + $0x444] ss:$8 sps:$4 sm:$0xff]  }
  0x71   : > { %2074 = vmatpush1.bf16.msra.mxu1 %v3019_v6  ;;  %v3037_v18 = vld [vmem:[%s3809_s9 + $0x40] ss:$8 sps:$4 sm:$0xff]   ;;  %v3039_v20 = vld [vmem:[%s3809_s9 + $0x54] ss:$8 sps:$4 sm:$0xff]   ;;  %v3043_v22 = vld [vmem:[%s3809_s9 + $0x50] ss:$8 sps:$4 sm:$0xff]  }
  0x72   : > { %2238 = vmatpush1.bf16.msra.mxu0 %v3020_v7  ;;  %2075 = vmatprep.subr.bf16.mxu1 %v3021_v8  ;;  %v3038_v19 = vld [vmem:[%s3809_s9 + $0x440] ss:$8 sps:$4 sm:$0xff]   ;;  %v3041_v21 = vld [vmem:[%s3809_s9 + $0x454] ss:$8 sps:$4 sm:$0xff]   ;;  %v3044_v23 = vld [vmem:[%s3809_s9 + $0x450] ss:$8 sps:$4 sm:$0xff]  }
  0x73   : > { %2239 = vmatprep.subr.bf16.mxu0 %v3023_v9  ;;  %v3045_v24 = vld [vmem:[%s3809_s9 + $0x64] ss:$8 sps:$4 sm:$0xff]   ;;  %v3049_v26 = vld [vmem:[%s3809_s9 + $0x60] ss:$8 sps:$4 sm:$0xff]   ;;  %v3051_v28 = vld [vmem:[%s3809_s9 + $0x74] ss:$8 sps:$4 sm:$0xff]  }
  0x74   : > { %v3047_v25 = vld [vmem:[%s3809_s9 + $0x464] ss:$8 sps:$4 sm:$0xff]   ;;  %v3050_v27 = vld [vmem:[%s3809_s9 + $0x460] ss:$8 sps:$4 sm:$0xff]   ;;  %v3053_v29 = vld [vmem:[%s3809_s9 + $0x474] ss:$8 sps:$4 sm:$0xff]  }
  0x75   : > { %2076 = vmatpush1.bf16.msra.mxu1 %v3025_v10  ;;  %v3055_v30 = vld [vmem:[%s3809_s9 + $0x70] ss:$8 sps:$4 sm:$0xff]   ;;  %v3057_v32 = vld [vmem:[%s3809_s9 + $0x84] ss:$8 sps:$4 sm:$0xff]   ;;  %v3061_v34 = vld [vmem:[%s3809_s9 + $0x80] ss:$8 sps:$4 sm:$0xff]  }
  0x76   : > { %2240 = vmatpush1.bf16.msra.mxu0 %v3026_v11  ;;  %2077 = vmatprep.subr.bf16.mxu1 %v3027_v12  ;;  %v3056_v31 = vld [vmem:[%s3809_s9 + $0x470] ss:$8 sps:$4 sm:$0xff]   ;;  %v3059_v33 = vld [vmem:[%s3809_s9 + $0x484] ss:$8 sps:$4 sm:$0xff]   ;;  %v3062_v35 = vld [vmem:[%s3809_s9 + $0x480] ss:$8 sps:$4 sm:$0xff]  }
  0x77   : > { %2241 = vmatprep.subr.bf16.mxu0 %v3029_v13  ;;  %v3607_v36 = vmov 1983009808   ;;  %v3063_v39 = vld [vmem:[%s3809_s9 + $0x94] ss:$8 sps:$4 sm:$0xff]   ;;  %v3067_v41 = vld [vmem:[%s3809_s9 + $0x90] ss:$8 sps:$4 sm:$0xff]  }
  0x78   : > { %v539_v37 = vunpack.c.l.s4 %v3607_v36  ;;  %v3065_v40 = vld [vmem:[%s3809_s9 + $0x494] ss:$8 sps:$4 sm:$0xff]   ;;  %v542_v43 = vshrl.u32 %v541_v38, 7  ;;  %v3068_v44 = vld [vmem:[%s3809_s9 + $0x490] ss:$8 sps:$4 sm:$0xff]   ;;  %vm2440_vm0 = vcmask 1043456  }
  0x79   : > { %2078 = vmatpush1.bf16.msra.mxu1 %v3031_v14  ;;  %v3069_v45 = vld [vmem:[%s3809_s9 + $0xa4] ss:$8 sps:$4 sm:$0xff]   ;;  %v3073_v47 = vld [vmem:[%s3809_s9 + $0xa0] ss:$8 sps:$4 sm:$0xff]   ;;  %v3075_v50 = vld [vmem:[%s3809_s9 + $0xb4] ss:$8 sps:$4 sm:$0xff]  }
  0x7a   : > { %2242 = vmatpush1.bf16.msra.mxu0 %v3032_v15  ;;  %2079 = vmatprep.subr.bf16.mxu1 %v3033_v16  ;;  %v540_v42 = vunpack.c.0.s8 %v539_v37  ;;  %v3071_v46 = vld [vmem:[%s3809_s9 + $0x4a4] ss:$8 sps:$4 sm:$0xff]   ;;  %v3074_v48 = vld [vmem:[%s3809_s9 + $0x4a0] ss:$8 sps:$4 sm:$0xff]   ;;  %v3077_v51 = vld [vmem:[%s3809_s9 + $0x4b4] ss:$8 sps:$4 sm:$0xff]  }
  0x7b   : > { %2243 = vmatprep.subr.bf16.mxu0 %v3035_v17  ;;  %v239_v52 = vld [vmem:[%s3801_s29] sm:$0xff]  ;;  %v241_v56 = vld [vmem:[%s3801_s29 + $0x10] sm:$0xff]  ;;  %s2465_s22 = sld [smem:[#allocation2]]  ;;  %s2901_s11 = sld [smem:[#allocation2 + $0x1]] }
  0x7c   : > { %v3859_v49 = vsub.s32 %v540_v42, %v542_v43  ;;  %v3079_v53 = vld [vmem:[%s3809_s9 + $0xb0] ss:$8 sps:$4 sm:$0xff]   ;;  %v3081_v57 = vld [vmem:[%s3809_s9 + $0xc4] ss:$8 sps:$4 sm:$0xff]   ;;  %v3085_v62 = vld [vmem:[%s3809_s9 + $0xc0] ss:$8 sps:$4 sm:$0xff]   ;;  %v537_v10 = vcombine.high %v239_v52, %v239_v52  ;;  %v571_v11 = vcombine.high %v241_v56, %v241_v56 }
  0x7d   : > { %2080 = vmatpush1.bf16.msra.mxu1 %v3037_v18  ;;  %v3080_v55 = vld [vmem:[%s3809_s9 + $0x4b0] ss:$8 sps:$4 sm:$0xff]   ;;  %v3083_v58 = vld [vmem:[%s3809_s9 + $0x4c4] ss:$8 sps:$4 sm:$0xff]   ;;  %v3086_v63 = vld [vmem:[%s3809_s9 + $0x4c0] ss:$8 sps:$4 sm:$0xff]  }
  0x7e   : > { %2244 = vmatpush1.bf16.msra.mxu0 %v3038_v19  ;;  %2081 = vmatprep.subr.bf16.mxu1 %v3039_v20  ;;  %v544_v54 = vrot.slane %v239_v52, %v3859_v49  ;;  %v578_v60 = vrot.slane %v241_v56, %v3859_v49  ;;  %v3087_v0 = vld [vmem:[%s3809_s9 + $0xd4] ss:$8 sps:$4 sm:$0xff]   ;;  %v3091_v2 = vld [vmem:[%s3809_s9 + $0xd0] ss:$8 sps:$4 sm:$0xff]   ;;  %v3093_v4 = vld [vmem:[%s3809_s9 + $0xe4] ss:$8 sps:$4 sm:$0xff]   ;;  %v3888_v16 = vrot.slane %v537_v10, %v3859_v49 }
  0x7f   : > { %2245 = vmatprep.subr.bf16.mxu0 %v3041_v21  ;;  %v3089_v1 = vld [vmem:[%s3809_s9 + $0x4d4] ss:$8 sps:$4 sm:$0xff]   ;;  %v3092_v3 = vld [vmem:[%s3809_s9 + $0x4d0] ss:$8 sps:$4 sm:$0xff]   ;;  %v3095_v5 = vld [vmem:[%s3809_s9 + $0x4e4] ss:$8 sps:$4 sm:$0xff]   ;;  %v3891_v17 = vrot.slane %v571_v11, %v3859_v49 }
  0x80   : > { %v552_v59 = vcombine.high %v544_v54, %v544_v54  ;;  %v586_v61 = vcombine.high %v578_v60, %v578_v60  ;;  %v3097_v6 = vld [vmem:[%s3809_s9 + $0xe0] ss:$8 sps:$4 sm:$0xff]   ;;  %v3099_v8 = vld [vmem:[%s3809_s9 + $0xf4] ss:$8 sps:$4 sm:$0xff]   ;;  %v3103_v12 = vld [vmem:[%s3809_s9 + $0xf0] ss:$8 sps:$4 sm:$0xff]  }
  0x81   : > { %2082 = vmatpush1.bf16.msra.mxu1 %v3043_v22  ;;  %v3098_v7 = vld [vmem:[%s3809_s9 + $0x4e0] ss:$8 sps:$4 sm:$0xff]   ;;  %v3101_v9 = vld [vmem:[%s3809_s9 + $0x4f4] ss:$8 sps:$4 sm:$0xff]   ;;  %v3104_v13 = vld [vmem:[%s3809_s9 + $0x4f0] ss:$8 sps:$4 sm:$0xff]   ;;  %v553_v22 = vcombine.high %v3888_v16, %v3888_v16 }
  0x82   : > { %2246 = vmatpush1.bf16.msra.mxu0 %v3044_v23  ;;  %2083 = vmatprep.subr.bf16.mxu1 %v3045_v24  ;;  %v3108_v14 = vld [vmem:[%s3809_s9 + $0x104] ss:$8 sps:$4 sm:$0xff]   ;;  %v3106_v18 = vld [vmem:[%s3809_s9 + $0x100] ss:$8 sps:$4 sm:$0xff]   ;;  %v3115_v20 = vld [vmem:[%s3809_s9 + $0x114] ss:$8 sps:$4 sm:$0xff]   ;;  %v587_v23 = vcombine.high %v3891_v17, %v3891_v17 }
  0x83   : > { %2247 = vmatprep.subr.bf16.mxu0 %v3047_v25  ;;  %2103 = vmatprep.mubr.bf16.mxu1 %v552_v59  ;;  %v3112_v15 = vld [vmem:[%s3809_s9 + $0x504] ss:$8 sps:$4 sm:$0xff]   ;;  %v3110_v19 = vld [vmem:[%s3809_s9 + $0x500] ss:$8 sps:$4 sm:$0xff]   ;;  %v3118_v21 = vld [vmem:[%s3809_s9 + $0x514] ss:$8 sps:$4 sm:$0xff]  }
  0x84   : > { %2267 = vmatprep.mubr.bf16.mxu0 %v586_v61  ;;  %v3113_v24 = vld [vmem:[%s3809_s9 + $0x110] ss:$8 sps:$4 sm:$0xff]   ;;  %v3131_v36 = vld [vmem:[%s3809_s9 + $0x140] ss:$8 sps:$4 sm:$0xff]   ;;  %v3139_v38 = vld [vmem:[%s3809_s9 + $0x154] ss:$8 sps:$4 sm:$0xff]  }
  0x85   : > { %2084 = vmatpush1.bf16.msra.mxu1 %v3049_v26  ;;  %v3116_v25 = vld [vmem:[%s3809_s9 + $0x510] ss:$8 sps:$4 sm:$0xff]   ;;  %v3121_v26 = vld [vmem:[%s3809_s9 + $0x124] ss:$8 sps:$4 sm:$0xff]   ;;  %v3134_v37 = vld [vmem:[%s3809_s9 + $0x540] ss:$8 sps:$4 sm:$0xff]  }
  0x86   : > { %2248 = vmatpush1.bf16.msra.mxu0 %v3050_v27  ;;  %2085 = vmatprep.subr.bf16.mxu1 %v3051_v28  ;;  %v3124_v27 = vld [vmem:[%s3809_s9 + $0x524] ss:$8 sps:$4 sm:$0xff]   ;;  %v3119_v28 = vld [vmem:[%s3809_s9 + $0x120] ss:$8 sps:$4 sm:$0xff]   ;;  %v3166_v56 = vld [vmem:[%s3809_s9 + $0x594] ss:$8 sps:$4 sm:$0xff]  }
  0x87   : > { %2249 = vmatprep.subr.bf16.mxu0 %v3053_v29  ;;  %v3122_v29 = vld [vmem:[%s3809_s9 + $0x520] ss:$8 sps:$4 sm:$0xff]   ;;  %v3145_v42 = vld [vmem:[%s3809_s9 + $0x164] ss:$8 sps:$4 sm:$0xff]   ;;  %v3188_v10 = vld [vmem:[%s3809_s9 + $0x5d0] ss:$8 sps:$4 sm:$0xff]  }
  0x88   : > { %v3148_v43 = vld [vmem:[%s3809_s9 + $0x564] ss:$8 sps:$4 sm:$0xff]   ;;  %v3167_v61 = vld [vmem:[%s3809_s9 + $0x1a0] ss:$8 sps:$4 sm:$0xff]   ;;  %s2611_s27 = sshll.u32 %s3797_s30, 3  ;;  %s2907_s19 = sshll.u32 %s3650_s16, 7 }
  0x89   : > { %2086 = vmatpush1.bf16.msra.mxu1 %v3055_v30  ;;  %v3127_v30 = vld [vmem:[%s3809_s9 + $0x134] ss:$8 sps:$4 sm:$0xff]   ;;  %v3160_v52 = vld [vmem:[%s3809_s9 + $0x584] ss:$8 sps:$4 sm:$0xff]   ;;  %s238_s20 = scalar_lea.vmem [#allocation9], %s2611_s27  ;;  %s4172_s28 = scalar_lea.hbm %s4219_s3, %s2907_s19 }
  0x8a   : > { %2250 = vmatpush1.bf16.msra.mxu0 %v3056_v31  ;;  %2087 = vmatprep.subr.bf16.mxu1 %v3057_v32  ;;  %v3130_v31 = vld [vmem:[%s3809_s9 + $0x534] ss:$8 sps:$4 sm:$0xff]   ;;  %v3125_v32 = vld [vmem:[%s3809_s9 + $0x130] ss:$8 sps:$4 sm:$0xff]   ;;  %v3169_v59 = vld [vmem:[%s3809_s9 + $0x1a4] ss:$8 sps:$4 sm:$0xff]  }
  0x8b   : > { %2251 = vmatprep.subr.bf16.mxu0 %v3059_v33  ;;  %v3128_v33 = vld [vmem:[%s3809_s9 + $0x530] ss:$8 sps:$4 sm:$0xff]   ;;  %v3193_v11 = vld [vmem:[%s3809_s9 + $0x1e4] ss:$8 sps:$4 sm:$0xff]   ;;  %s2498_s4 = sshll.u32 %s238_s20, 4  ;;  %s2484_s10 = scalar_lea.sflag [#allocation4], %s3797_s30  ;;  %s4174_s4 = int_to_ptr.vmem [resolvable:$true] %s2498_s4 }
  0x8c   : > { %s3526_s17 = scalar_lea.vmem %s4174_s4, 128  ;;  %p4232_p3 = scmp.ne.s32.totalorder %s4224_s23, 0 }
  0x8d   : > { %2088 = vmatpush1.bf16.msra.mxu1 %v3061_v34  ;;  %v3133_v34 = vld [vmem:[%s3809_s9 + $0x144] ss:$8 sps:$4 sm:$0xff]   ;;  %p3527_p11 = scmp.ne.s32.totalorder %s4174_s4, %s3526_s17  ;;  %s3608_s16 = smov [#allocation9]  }
  0x8e   : > { %2252 = vmatpush1.bf16.msra.mxu0 %v3062_v35  ;;  %2089 = vmatprep.subr.bf16.mxu1 %v3063_v39  ;;  %v3136_v35 = vld [vmem:[%s3809_s9 + $0x544] ss:$8 sps:$4 sm:$0xff]   ;;  %v3142_v39 = vld [vmem:[%s3809_s9 + $0x554] ss:$8 sps:$4 sm:$0xff]   ;;  %s3530_s5 = sshll.u32 %s3608_s16, 4  ;;  %s3531_s5 = int_to_ptr.vmem [resolvable:$false] %s3530_s5 }
  0x8f   : > { %2253 = vmatprep.subr.bf16.mxu0 %v3065_v40  ;;  %v3137_v40 = vld [vmem:[%s3809_s9 + $0x150] ss:$8 sps:$4 sm:$0xff]   ;;  %p3528_p12 = pnand %p3527_p11, %p4232_p3  ;;  %s3532_s6 = scalar_lea.vmem %s3531_s5, 256 }
  0x90   : > { %p3533_p4 = scmp.lt.s32.totalorder %s4174_s4, %s3531_s5  ;;  %p3534_p2 = scmp.lt.s32.totalorder %s3532_s6, %s3526_s17 }
  0x91   : > { %2090 = vmatpush1.bf16.msra.mxu1 %v3067_v41  ;;  %v3140_v41 = vld [vmem:[%s3809_s9 + $0x550] ss:$8 sps:$4 sm:$0xff]   ;;  %p3529_p1 = pneg %p3528_p12 }
  0x92   : > { %2254 = vmatpush1.bf16.msra.mxu0 %v3068_v44  ;;  %2091 = vmatprep.subr.bf16.mxu1 %v3069_v45  ;;  %v3143_v44 = vld [vmem:[%s3809_s9 + $0x160] ss:$8 sps:$4 sm:$0xff]   ;;  %p3535_p5 = por %p3534_p2, %p3533_p4 }
  0x93   : > { %2255 = vmatprep.subr.bf16.mxu0 %v3071_v46  ;;  %v3146_v45 = vld [vmem:[%s3809_s9 + $0x560] ss:$8 sps:$4 sm:$0xff]   ;;  %v3151_v46 = vld [vmem:[%s3809_s9 + $0x174] ss:$8 sps:$4 sm:$0xff]  }
  0x94   : > { %p3536_p13 = pnand %p3535_p5, %p3529_p1 }
  0x95   : > { %2092 = vmatpush1.bf16.msra.mxu1 %v3073_v47  ;;  %v3154_v47 = vld [vmem:[%s3809_s9 + $0x574] ss:$8 sps:$4 sm:$0xff]  }
  0x96   : > { %2256 = vmatpush1.bf16.msra.mxu0 %v3074_v48  ;;  %2093 = vmatprep.subr.bf16.mxu1 %v3075_v50  ;;  %v3149_v48 = vld [vmem:[%s3809_s9 + $0x170] ss:$8 sps:$4 sm:$0xff]  }
  0x97   : > { %2257 = vmatprep.subr.bf16.mxu0 %v3077_v51  ;;  %v3152_v50 = vld [vmem:[%s3809_s9 + $0x570] ss:$8 sps:$4 sm:$0xff]   ;;  %v3157_v51 = vld [vmem:[%s3809_s9 + $0x184] ss:$8 sps:$4 sm:$0xff]  }
  0x99   : > { %2094 = vmatpush1.bf16.msra.mxu1 %v3079_v53  ;;  %v3155_v53 = vld [vmem:[%s3809_s9 + $0x180] ss:$8 sps:$4 sm:$0xff]  }
  0x9a   : > { %2258 = vmatpush1.bf16.msra.mxu0 %v3080_v55  ;;  %2095 = vmatprep.subr.bf16.mxu1 %v3081_v57  ;;  %v3163_v55 = vld [vmem:[%s3809_s9 + $0x194] ss:$8 sps:$4 sm:$0xff]   ;;  %v3161_v57 = vld [vmem:[%s3809_s9 + $0x190] ss:$8 sps:$4 sm:$0xff]  }
  0x9b   : > { %2259 = vmatprep.subr.bf16.mxu0 %v3083_v58  ;;  %v3164_v58 = vld [vmem:[%s3809_s9 + $0x590] ss:$8 sps:$4 sm:$0xff]  }
  0x9d   : > { %2096 = vmatpush1.bf16.msra.mxu1 %v3085_v62  ;;  %v3170_v62 = vld [vmem:[%s3809_s9 + $0x5a0] ss:$8 sps:$4 sm:$0xff]  }
  0x9e   : > { %2260 = vmatpush1.bf16.msra.mxu0 %v3086_v63  ;;  %2097 = vmatprep.subr.bf16.mxu1 %v3087_v0  ;;  %v3175_v63 = vld [vmem:[%s3809_s9 + $0x1b4] ss:$8 sps:$4 sm:$0xff]  }
  0x9f   : > { %2261 = vmatprep.subr.bf16.mxu0 %v3089_v1  ;;  %v3178_v0 = vld [vmem:[%s3809_s9 + $0x5b4] ss:$8 sps:$4 sm:$0xff]   ;;  %v3173_v1 = vld [vmem:[%s3809_s9 + $0x1b0] ss:$8 sps:$4 sm:$0xff]  }
  0xa1   : > { %2098 = vmatpush1.bf16.msra.mxu1 %v3091_v2  ;;  %v3176_v2 = vld [vmem:[%s3809_s9 + $0x5b0] ss:$8 sps:$4 sm:$0xff]  }
  0xa2   : > { %2262 = vmatpush1.bf16.msra.mxu0 %v3092_v3  ;;  %2099 = vmatprep.subr.bf16.mxu1 %v3093_v4  ;;  %v3181_v3 = vld [vmem:[%s3809_s9 + $0x1c4] ss:$8 sps:$4 sm:$0xff]  }
  0xa3   : > { %2263 = vmatprep.subr.bf16.mxu0 %v3095_v5  ;;  %v3184_v4 = vld [vmem:[%s3809_s9 + $0x5c4] ss:$8 sps:$4 sm:$0xff]   ;;  %v3179_v5 = vld [vmem:[%s3809_s9 + $0x1c0] ss:$8 sps:$4 sm:$0xff]  }
  0xa5   : > { %2100 = vmatpush1.bf16.msra.mxu1 %v3097_v6  ;;  %v3182_v6 = vld [vmem:[%s3809_s9 + $0x5c0] ss:$8 sps:$4 sm:$0xff]  }
  0xa6   : > { %2264 = vmatpush1.bf16.msra.mxu0 %v3098_v7  ;;  %2101 = vmatprep.subr.bf16.mxu1 %v3099_v8  ;;  %v3187_v7 = vld [vmem:[%s3809_s9 + $0x1d4] ss:$8 sps:$4 sm:$0xff]  }
  0xa7   : > { %2265 = vmatprep.subr.bf16.mxu0 %v3101_v9  ;;  %v3190_v8 = vld [vmem:[%s3809_s9 + $0x5d4] ss:$8 sps:$4 sm:$0xff]   ;;  %v3185_v9 = vld [vmem:[%s3809_s9 + $0x1d0] ss:$8 sps:$4 sm:$0xff]  }
  0xa9   : > { %2102 = vmatpush1.bf16.msra.mxu1 %v3103_v12  ;;  %v3196_v12 = vld [vmem:[%s3809_s9 + $0x5e4] ss:$8 sps:$4 sm:$0xff]  }
  0xaa   : > { %2266 = vmatpush1.bf16.msra.mxu0 %v3104_v13  ;;  %2112 = vmatprep.subr.bf16.mxu1 %v3108_v14  ;;  %v3191_v13 = vld [vmem:[%s3809_s9 + $0x1e0] ss:$8 sps:$4 sm:$0xff]  }
  0xab   : > { %2276 = vmatprep.subr.bf16.mxu0 %v3112_v15  ;;  %v3194_v14 = vld [vmem:[%s3809_s9 + $0x5e0] ss:$8 sps:$4 sm:$0xff]   ;;  %v3199_v15 = vld [vmem:[%s3809_s9 + $0x1f4] ss:$8 sps:$4 sm:$0xff]  }
  0xac   : > { %2104 = vmatmul.mubr.bf16.vlgmr.msra.gmra.mrb[0].mxu1 %v544_v54  ;;  %v3158_v54 = vld [vmem:[%s3809_s9 + $0x580] ss:$8 sps:$4 sm:$0xff]  }
  0xad   : > { %2268 = vmatmul.mubr.bf16.vlgmr.msra.gmra.mrb[0].mxu0 %v578_v60  ;;  %2113 = vmatpush1.bf16.msra.mxu1 %v3106_v18  ;;  %v3172_v60 = vld [vmem:[%s3809_s9 + $0x5a4] ss:$8 sps:$4 sm:$0xff]   ;;  %v3202_v18 = vld [vmem:[%s3809_s9 + $0x5f4] ss:$8 sps:$4 sm:$0xff]  }
  0xae   : > { %2277 = vmatpush1.bf16.msra.mxu0 %v3110_v19  ;;  %2114 = vmatprep.subr.bf16.mxu1 %v3115_v20  ;;  %v3197_v19 = vld [vmem:[%s3809_s9 + $0x1f0] ss:$8 sps:$4 sm:$0xff]  }
  0xaf   : > { %2278 = vmatprep.subr.bf16.mxu0 %v3118_v21  ;;  %2144 = vmatprep.mubr.bf16.mxu1 %v553_v22  ;;  %v3200_v20 = vld [vmem:[%s3809_s9 + $0x5f0] ss:$8 sps:$4 sm:$0xff]   ;;  %v3205_v21 = vld [vmem:[%s3809_s9 + $0x204] ss:$8 sps:$4 sm:$0xff]  }
  0xb0   : > { %2308 = vmatprep.mubr.bf16.mxu0 %v587_v23  ;;  %v3208_v22 = vld [vmem:[%s3809_s9 + $0x604] ss:$8 sps:$4 sm:$0xff]   ;;  %v3203_v23 = vld [vmem:[%s3809_s9 + $0x200] ss:$8 sps:$4 sm:$0xff]  }
  0xb1   : > { %2115 = vmatpush1.bf16.msra.mxu1 %v3113_v24  ;;  %v3206_v24 = vld [vmem:[%s3809_s9 + $0x600] ss:$8 sps:$4 sm:$0xff]  }
  0xb2   : > { %2279 = vmatpush1.bf16.msra.mxu0 %v3116_v25  ;;  %2116 = vmatprep.subr.bf16.mxu1 %v3121_v26  ;;  %v3211_v25 = vld [vmem:[%s3809_s9 + $0x214] ss:$8 sps:$4 sm:$0xff]   ;;  %v3965_v26 = vld [vmem:[%s3801_s29 + $0x8] sm:$0xff] }
  0xb3   : > { %2280 = vmatprep.subr.bf16.mxu0 %v3124_v27  ;;  %v3214_v27 = vld [vmem:[%s3809_s9 + $0x614] ss:$8 sps:$4 sm:$0xff]  }
  0xb5   : > { %2117 = vmatpush1.bf16.msra.mxu1 %v3119_v28  ;;  %v3970_v28 = vrot.slane %v3965_v26, %v3859_v49 }
  0xb6   : > { %2281 = vmatpush1.bf16.msra.mxu0 %v3122_v29  ;;  %2118 = vmatprep.subr.bf16.mxu1 %v3127_v30  ;;  %v3973_v29 = vld [vmem:[%s3801_s29 + $0x18] sm:$0xff] }
  0xb7   : > { %2282 = vmatprep.subr.bf16.mxu0 %v3130_v31  ;;  %v3209_v30 = vld [vmem:[%s3809_s9 + $0x210] ss:$8 sps:$4 sm:$0xff]  }
  0xb8   : > { %v3212_v31 = vld [vmem:[%s3809_s9 + $0x610] ss:$8 sps:$4 sm:$0xff]  }
  0xb9   : > { %2119 = vmatpush1.bf16.msra.mxu1 %v3125_v32  ;;  %v569_v32 = vcombine.high %v3970_v28, %v3970_v28 }
  0xba   : > { %2283 = vmatpush1.bf16.msra.mxu0 %v3128_v33  ;;  %2120 = vmatprep.subr.bf16.mxu1 %v3133_v34  ;;  %v3983_v33 = vrot.slane %v3973_v29, %v3859_v49  ;;  %v3217_v34 = vld [vmem:[%s3809_s9 + $0x224] ss:$8 sps:$4 sm:$0xff]  }
  0xbb   : > { %2284 = vmatprep.subr.bf16.mxu0 %v3136_v35  ;;  %v3215_v35 = vld [vmem:[%s3809_s9 + $0x220] ss:$8 sps:$4 sm:$0xff]  }
  0xbd   : > { %2121 = vmatpush1.bf16.msra.mxu1 %v3131_v36  ;;  %v3218_v36 = vld [vmem:[%s3809_s9 + $0x620] ss:$8 sps:$4 sm:$0xff]  }
  0xbe   : > { %2285 = vmatpush1.bf16.msra.mxu0 %v3134_v37  ;;  %2122 = vmatprep.subr.bf16.mxu1 %v3139_v38  ;;  %v3223_v37 = vld [vmem:[%s3809_s9 + $0x234] ss:$8 sps:$4 sm:$0xff]  }
  0xbf   : > { %2286 = vmatprep.subr.bf16.mxu0 %v3142_v39  ;;  %v3226_v38 = vld [vmem:[%s3809_s9 + $0x634] ss:$8 sps:$4 sm:$0xff]   ;;  %v3221_v39 = vld [vmem:[%s3809_s9 + $0x230] ss:$8 sps:$4 sm:$0xff]  }
  0xc1   : > { %2123 = vmatpush1.bf16.msra.mxu1 %v3137_v40  ;;  %v3224_v40 = vld [vmem:[%s3809_s9 + $0x630] ss:$8 sps:$4 sm:$0xff]  }
  0xc2   : > { %2287 = vmatpush1.bf16.msra.mxu0 %v3140_v41  ;;  %2124 = vmatprep.subr.bf16.mxu1 %v3145_v42  ;;  %v3229_v41 = vld [vmem:[%s3809_s9 + $0x244] ss:$8 sps:$4 sm:$0xff]  }
  0xc3   : > { %2288 = vmatprep.subr.bf16.mxu0 %v3148_v43  ;;  %v3232_v42 = vld [vmem:[%s3809_s9 + $0x644] ss:$8 sps:$4 sm:$0xff]   ;;  %v3227_v43 = vld [vmem:[%s3809_s9 + $0x240] ss:$8 sps:$4 sm:$0xff]  }
  0xc5   : > { %2125 = vmatpush1.bf16.msra.mxu1 %v3143_v44  ;;  %v3230_v44 = vld [vmem:[%s3809_s9 + $0x640] ss:$8 sps:$4 sm:$0xff]  }
  0xc6   : > { %2289 = vmatpush1.bf16.msra.mxu0 %v3146_v45  ;;  %2126 = vmatprep.subr.bf16.mxu1 %v3151_v46  ;;  %v3235_v45 = vld [vmem:[%s3809_s9 + $0x254] ss:$8 sps:$4 sm:$0xff]  }
  0xc7   : > { %2290 = vmatprep.subr.bf16.mxu0 %v3154_v47  ;;  %v3238_v46 = vld [vmem:[%s3809_s9 + $0x654] ss:$8 sps:$4 sm:$0xff]   ;;  %v3233_v47 = vld [vmem:[%s3809_s9 + $0x250] ss:$8 sps:$4 sm:$0xff]  }
  0xc9   : > { %2127 = vmatpush1.bf16.msra.mxu1 %v3149_v48  ;;  %v3236_v48 = vld [vmem:[%s3809_s9 + $0x650] ss:$8 sps:$4 sm:$0xff]  }
  0xca   : > { %2291 = vmatpush1.bf16.msra.mxu0 %v3152_v50  ;;  %2128 = vmatprep.subr.bf16.mxu1 %v3157_v51  ;;  %v3241_v50 = vld [vmem:[%s3809_s9 + $0x264] ss:$8 sps:$4 sm:$0xff]  }
  0xcb   : > { %2292 = vmatprep.subr.bf16.mxu0 %v3160_v52  ;;  %v3244_v51 = vld [vmem:[%s3809_s9 + $0x664] ss:$8 sps:$4 sm:$0xff]   ;;  %v3239_v52 = vld [vmem:[%s3809_s9 + $0x260] ss:$8 sps:$4 sm:$0xff]  }
  0xcd   : > { %2129 = vmatpush1.bf16.msra.mxu1 %v3155_v53  ;;  %v3242_v53 = vld [vmem:[%s3809_s9 + $0x660] ss:$8 sps:$4 sm:$0xff]  }
  0xce   : > { %2293 = vmatpush1.bf16.msra.mxu0 %v3158_v54  ;;  %2130 = vmatprep.subr.bf16.mxu1 %v3163_v55  ;;  %v3247_v54 = vld [vmem:[%s3809_s9 + $0x274] ss:$8 sps:$4 sm:$0xff]  }
  0xcf   : > { %2294 = vmatprep.subr.bf16.mxu0 %v3166_v56  ;;  %v3250_v55 = vld [vmem:[%s3809_s9 + $0x674] ss:$8 sps:$4 sm:$0xff]   ;;  %v3245_v56 = vld [vmem:[%s3809_s9 + $0x270] ss:$8 sps:$4 sm:$0xff]  }
  0xd1   : > { %2131 = vmatpush1.bf16.msra.mxu1 %v3161_v57  ;;  %v3248_v57 = vld [vmem:[%s3809_s9 + $0x670] ss:$8 sps:$4 sm:$0xff]  }
  0xd2   : > { %2295 = vmatpush1.bf16.msra.mxu0 %v3164_v58  ;;  %2132 = vmatprep.subr.bf16.mxu1 %v3169_v59  ;;  %v3253_v58 = vld [vmem:[%s3809_s9 + $0x284] ss:$8 sps:$4 sm:$0xff]  }
  0xd3   : > { %2296 = vmatprep.subr.bf16.mxu0 %v3172_v60  ;;  %v3256_v59 = vld [vmem:[%s3809_s9 + $0x684] ss:$8 sps:$4 sm:$0xff]   ;;  %v3251_v60 = vld [vmem:[%s3809_s9 + $0x280] ss:$8 sps:$4 sm:$0xff]  }
  0xd5   : > { %2133 = vmatpush1.bf16.msra.mxu1 %v3167_v61  ;;  %v3254_v61 = vld [vmem:[%s3809_s9 + $0x680] ss:$8 sps:$4 sm:$0xff]  }
  0xd6   : > { %2297 = vmatpush1.bf16.msra.mxu0 %v3170_v62  ;;  %2134 = vmatprep.subr.bf16.mxu1 %v3175_v63  ;;  %v3259_v62 = vld [vmem:[%s3809_s9 + $0x294] ss:$8 sps:$4 sm:$0xff]  }
  0xd7   : > { %2298 = vmatprep.subr.bf16.mxu0 %v3178_v0  ;;  %v3262_v63 = vld [vmem:[%s3809_s9 + $0x694] ss:$8 sps:$4 sm:$0xff]   ;;  %v3257_v0 = vld [vmem:[%s3809_s9 + $0x290] ss:$8 sps:$4 sm:$0xff]  }
  0xd9   : > { %2135 = vmatpush1.bf16.msra.mxu1 %v3173_v1  ;;  %v3260_v1 = vld [vmem:[%s3809_s9 + $0x690] ss:$8 sps:$4 sm:$0xff]  }
  0xda   : > { %2299 = vmatpush1.bf16.msra.mxu0 %v3176_v2  ;;  %2136 = vmatprep.subr.bf16.mxu1 %v3181_v3  ;;  %v3265_v2 = vld [vmem:[%s3809_s9 + $0x2a4] ss:$8 sps:$4 sm:$0xff]  }
  0xdb   : > { %2300 = vmatprep.subr.bf16.mxu0 %v3184_v4  ;;  %v3268_v3 = vld [vmem:[%s3809_s9 + $0x6a4] ss:$8 sps:$4 sm:$0xff]   ;;  %v3263_v4 = vld [vmem:[%s3809_s9 + $0x2a0] ss:$8 sps:$4 sm:$0xff]  }
  0xdd   : > { %2137 = vmatpush1.bf16.msra.mxu1 %v3179_v5  ;;  %v3266_v5 = vld [vmem:[%s3809_s9 + $0x6a0] ss:$8 sps:$4 sm:$0xff]  }
  0xde   : > { %2301 = vmatpush1.bf16.msra.mxu0 %v3182_v6  ;;  %2138 = vmatprep.subr.bf16.mxu1 %v3187_v7  ;;  %v3271_v6 = vld [vmem:[%s3809_s9 + $0x2b4] ss:$8 sps:$4 sm:$0xff]  }
  0xdf   : > { %2302 = vmatprep.subr.bf16.mxu0 %v3190_v8  ;;  %v3274_v7 = vld [vmem:[%s3809_s9 + $0x6b4] ss:$8 sps:$4 sm:$0xff]   ;;  %v3269_v8 = vld [vmem:[%s3809_s9 + $0x2b0] ss:$8 sps:$4 sm:$0xff]  }
  0xe1   : > { %2139 = vmatpush1.bf16.msra.mxu1 %v3185_v9  ;;  %v3272_v9 = vld [vmem:[%s3809_s9 + $0x6b0] ss:$8 sps:$4 sm:$0xff]  }
  0xe2   : > { %2303 = vmatpush1.bf16.msra.mxu0 %v3188_v10  ;;  %2140 = vmatprep.subr.bf16.mxu1 %v3193_v11  ;;  %v3277_v10 = vld [vmem:[%s3809_s9 + $0x2c4] ss:$8 sps:$4 sm:$0xff]  }
  0xe3   : > { %2304 = vmatprep.subr.bf16.mxu0 %v3196_v12  ;;  %v3280_v11 = vld [vmem:[%s3809_s9 + $0x6c4] ss:$8 sps:$4 sm:$0xff]   ;;  %v3275_v12 = vld [vmem:[%s3809_s9 + $0x2c0] ss:$8 sps:$4 sm:$0xff]  }
  0xe5   : > { %2141 = vmatpush1.bf16.msra.mxu1 %v3191_v13  ;;  %v3278_v13 = vld [vmem:[%s3809_s9 + $0x6c0] ss:$8 sps:$4 sm:$0xff]  }
  0xe6   : > { %2305 = vmatpush1.bf16.msra.mxu0 %v3194_v14  ;;  %2142 = vmatprep.subr.bf16.mxu1 %v3199_v15  ;;  %v3283_v14 = vld [vmem:[%s3809_s9 + $0x2d4] ss:$8 sps:$4 sm:$0xff]  }
  0xe7   : > { %2306 = vmatprep.subr.bf16.mxu0 %v3202_v18  ;;  %v3286_v15 = vld [vmem:[%s3809_s9 + $0x6d4] ss:$8 sps:$4 sm:$0xff]   ;;  %v3281_v18 = vld [vmem:[%s3809_s9 + $0x2d0] ss:$8 sps:$4 sm:$0xff]  }
  0xe9   : > { %2143 = vmatpush1.bf16.msra.mxu1 %v3197_v19  ;;  %v3284_v19 = vld [vmem:[%s3809_s9 + $0x6d0] ss:$8 sps:$4 sm:$0xff]  }
  0xea   : > { %2307 = vmatpush1.bf16.msra.mxu0 %v3200_v20  ;;  %2153 = vmatprep.subr.bf16.mxu1 %v3205_v21  ;;  %v3289_v20 = vld [vmem:[%s3809_s9 + $0x2e4] ss:$8 sps:$4 sm:$0xff]  }
  0xeb   : > { %2317 = vmatprep.subr.bf16.mxu0 %v3208_v22  ;;  %v3292_v21 = vld [vmem:[%s3809_s9 + $0x6e4] ss:$8 sps:$4 sm:$0xff]   ;;  %v3287_v22 = vld [vmem:[%s3809_s9 + $0x2e0] ss:$8 sps:$4 sm:$0xff]  }
  0xec   : > { %2145 = vmatmul.mubr.bf16.vlgmr.msra.gmra.mrb[0].mxu1 %v3888_v16  ;;  %v3220_v16 = vld [vmem:[%s3809_s9 + $0x624] ss:$8 sps:$4 sm:$0xff]  }
  0xed   : > { %2309 = vmatmul.mubr.bf16.vlgmr.msra.gmra.mrb[0].mxu0 %v3891_v17  ;;  %2154 = vmatpush1.bf16.msra.mxu1 %v3203_v23  ;;  %v603_v17 = vcombine.high %v3983_v33, %v3983_v33  ;;  %v3290_v23 = vld [vmem:[%s3809_s9 + $0x6e0] ss:$8 sps:$4 sm:$0xff]  }
  0xee   : > { %2318 = vmatpush1.bf16.msra.mxu0 %v3206_v24  ;;  %2155 = vmatprep.subr.bf16.mxu1 %v3211_v25  ;;  %v3295_v24 = vld [vmem:[%s3809_s9 + $0x2f4] ss:$8 sps:$4 sm:$0xff]  }
  0xef   : > { %2319 = vmatprep.subr.bf16.mxu0 %v3214_v27  ;;  %2185 = vmatprep.mubr.bf16.mxu1 %v569_v32  ;;  %v3298_v25 = vld [vmem:[%s3809_s9 + $0x6f4] ss:$8 sps:$4 sm:$0xff]   ;;  %v554_v27 = vcombine.high %v3965_v26, %v3965_v26  ;;  %v3296_v32 = vld [vmem:[%s3809_s9 + $0x6f0] ss:$8 sps:$4 sm:$0xff]   ;;  %v3299_v26 = vld [vmem:[%s3809_s9 + $0x300] ss:$8 sps:$4 sm:$0xff]  }
  0xf0   : > { %2349 = vmatprep.mubr.bf16.mxu0 %v603_v17 }
  0xf1   : > { %2156 = vmatpush1.bf16.msra.mxu1 %v3209_v30  ;;  %v588_v30 = vcombine.high %v3973_v29, %v3973_v29  ;;  %v4050_v17 = vrot.slane %v554_v27, %v3859_v49  ;;  %v3302_v29 = vld [vmem:[%s3809_s9 + $0x700] ss:$8 sps:$4 sm:$0xff]   ;;  %v3385_v27 = vld [vmem:[%s3809_s9 + $0x3e4] ss:$8 sps:$4 sm:$0xff]  }
  0xf2   : > { %2320 = vmatpush1.bf16.msra.mxu0 %v3212_v31  ;;  %2157 = vmatprep.subr.bf16.mxu1 %v3217_v34  ;;  %v3293_v31 = vld [vmem:[%s3809_s9 + $0x2f0] ss:$8 sps:$4 sm:$0xff]   ;;  %v3301_v34 = vld [vmem:[%s3809_s9 + $0x304] ss:$8 sps:$4 sm:$0xff]  }
  0xf3   : > { %2321 = vmatprep.subr.bf16.mxu0 %v3220_v16  ;;  %v3304_v16 = vld [vmem:[%s3809_s9 + $0x704] ss:$8 sps:$4 sm:$0xff]  }
  0xf5   : > { %2158 = vmatpush1.bf16.msra.mxu1 %v3215_v35  ;;  %v4053_v35 = vrot.slane %v588_v30, %v3859_v49  ;;  %v3305_v49 = vld [vmem:[%s3809_s9 + $0x310] ss:$8 sps:$4 sm:$0xff]   ;;  %v3388_v30 = vld [vmem:[%s3809_s9 + $0x7e4] ss:$8 sps:$4 sm:$0xff]  }
  0xf6   : > { %2322 = vmatpush1.bf16.msra.mxu0 %v3218_v36  ;;  %2159 = vmatprep.subr.bf16.mxu1 %v3223_v37  ;;  %v3307_v36 = vld [vmem:[%s3809_s9 + $0x314] ss:$8 sps:$4 sm:$0xff]  }
  0xf7   : > { %2323 = vmatprep.subr.bf16.mxu0 %v3226_v38  ;;  %v3310_v37 = vld [vmem:[%s3809_s9 + $0x714] ss:$8 sps:$4 sm:$0xff]   ;;  %v570_v38 = vcombine.high %v4050_v17, %v4050_v17 }
  0xf9   : > { %2160 = vmatpush1.bf16.msra.mxu1 %v3221_v39  ;;  %v604_v39 = vcombine.high %v4053_v35, %v4053_v35 }
  0xfa   : > { %2324 = vmatpush1.bf16.msra.mxu0 %v3224_v40  ;;  %2161 = vmatprep.subr.bf16.mxu1 %v3229_v41  ;;  %v3308_v40 = vld [vmem:[%s3809_s9 + $0x710] ss:$8 sps:$4 sm:$0xff]   ;;  %v3313_v41 = vld [vmem:[%s3809_s9 + $0x324] ss:$8 sps:$4 sm:$0xff]  }
  0xfb   : > { %2325 = vmatprep.subr.bf16.mxu0 %v3232_v42  ;;  %v3316_v42 = vld [vmem:[%s3809_s9 + $0x724] ss:$8 sps:$4 sm:$0xff]  }
  0xfd   : > { %2162 = vmatpush1.bf16.msra.mxu1 %v3227_v43  ;;  %v3319_v43 = vld [vmem:[%s3809_s9 + $0x334] ss:$8 sps:$4 sm:$0xff]  }
  0xfe   : > { %2326 = vmatpush1.bf16.msra.mxu0 %v3230_v44  ;;  %2163 = vmatprep.subr.bf16.mxu1 %v3235_v45  ;;  %v3322_v44 = vld [vmem:[%s3809_s9 + $0x734] ss:$8 sps:$4 sm:$0xff]   ;;  %v3317_v45 = vld [vmem:[%s3809_s9 + $0x330] ss:$8 sps:$4 sm:$0xff]  }
  0xff   : > { %2327 = vmatprep.subr.bf16.mxu0 %v3238_v46  ;;  %v3320_v46 = vld [vmem:[%s3809_s9 + $0x730] ss:$8 sps:$4 sm:$0xff]  }
 0x101   : > { %2164 = vmatpush1.bf16.msra.mxu1 %v3233_v47  ;;  %v3325_v47 = vld [vmem:[%s3809_s9 + $0x344] ss:$8 sps:$4 sm:$0xff]  }
 0x102   : > { %2328 = vmatpush1.bf16.msra.mxu0 %v3236_v48  ;;  %2165 = vmatprep.subr.bf16.mxu1 %v3241_v50  ;;  %v3328_v48 = vld [vmem:[%s3809_s9 + $0x744] ss:$8 sps:$4 sm:$0xff]   ;;  %v3323_v50 = vld [vmem:[%s3809_s9 + $0x340] ss:$8 sps:$4 sm:$0xff]  }
 0x103   : > { %2329 = vmatprep.subr.bf16.mxu0 %v3244_v51  ;;  %v3326_v51 = vld [vmem:[%s3809_s9 + $0x740] ss:$8 sps:$4 sm:$0xff]  }
 0x105   : > { %2166 = vmatpush1.bf16.msra.mxu1 %v3239_v52  ;;  %v3331_v52 = vld [vmem:[%s3809_s9 + $0x354] ss:$8 sps:$4 sm:$0xff]  }
 0x106   : > { %2330 = vmatpush1.bf16.msra.mxu0 %v3242_v53  ;;  %2167 = vmatprep.subr.bf16.mxu1 %v3247_v54  ;;  %v3334_v53 = vld [vmem:[%s3809_s9 + $0x754] ss:$8 sps:$4 sm:$0xff]   ;;  %v3329_v54 = vld [vmem:[%s3809_s9 + $0x350] ss:$8 sps:$4 sm:$0xff]  }
 0x107   : > { %2331 = vmatprep.subr.bf16.mxu0 %v3250_v55  ;;  %v3332_v55 = vld [vmem:[%s3809_s9 + $0x750] ss:$8 sps:$4 sm:$0xff]  }
 0x109   : > { %2168 = vmatpush1.bf16.msra.mxu1 %v3245_v56  ;;  %v3337_v56 = vld [vmem:[%s3809_s9 + $0x364] ss:$8 sps:$4 sm:$0xff]  }
 0x10a   : > { %2332 = vmatpush1.bf16.msra.mxu0 %v3248_v57  ;;  %2169 = vmatprep.subr.bf16.mxu1 %v3253_v58  ;;  %v3340_v57 = vld [vmem:[%s3809_s9 + $0x764] ss:$8 sps:$4 sm:$0xff]   ;;  %v3335_v58 = vld [vmem:[%s3809_s9 + $0x360] ss:$8 sps:$4 sm:$0xff]  }
 0x10b   : > { %2333 = vmatprep.subr.bf16.mxu0 %v3256_v59  ;;  %v3338_v59 = vld [vmem:[%s3809_s9 + $0x760] ss:$8 sps:$4 sm:$0xff]  }
 0x10d   : > { %2170 = vmatpush1.bf16.msra.mxu1 %v3251_v60  ;;  %v3343_v60 = vld [vmem:[%s3809_s9 + $0x374] ss:$8 sps:$4 sm:$0xff]  }
 0x10e   : > { %2334 = vmatpush1.bf16.msra.mxu0 %v3254_v61  ;;  %2171 = vmatprep.subr.bf16.mxu1 %v3259_v62  ;;  %v3346_v61 = vld [vmem:[%s3809_s9 + $0x774] ss:$8 sps:$4 sm:$0xff]   ;;  %v3341_v62 = vld [vmem:[%s3809_s9 + $0x370] ss:$8 sps:$4 sm:$0xff]  }
 0x10f   : > { %2335 = vmatprep.subr.bf16.mxu0 %v3262_v63  ;;  %v3344_v63 = vld [vmem:[%s3809_s9 + $0x770] ss:$8 sps:$4 sm:$0xff]  }
 0x111   : > { %2172 = vmatpush1.bf16.msra.mxu1 %v3257_v0  ;;  %v3349_v0 = vld [vmem:[%s3809_s9 + $0x384] ss:$8 sps:$4 sm:$0xff]  }
 0x112   : > { %2336 = vmatpush1.bf16.msra.mxu0 %v3260_v1  ;;  %2173 = vmatprep.subr.bf16.mxu1 %v3265_v2  ;;  %v3352_v1 = vld [vmem:[%s3809_s9 + $0x784] ss:$8 sps:$4 sm:$0xff]   ;;  %v3347_v2 = vld [vmem:[%s3809_s9 + $0x380] ss:$8 sps:$4 sm:$0xff]  }
 0x113   : > { %2337 = vmatprep.subr.bf16.mxu0 %v3268_v3  ;;  %v3350_v3 = vld [vmem:[%s3809_s9 + $0x780] ss:$8 sps:$4 sm:$0xff]  }
 0x115   : > { %2174 = vmatpush1.bf16.msra.mxu1 %v3263_v4  ;;  %v3355_v4 = vld [vmem:[%s3809_s9 + $0x394] ss:$8 sps:$4 sm:$0xff]  }
 0x116   : > { %2338 = vmatpush1.bf16.msra.mxu0 %v3266_v5  ;;  %2175 = vmatprep.subr.bf16.mxu1 %v3271_v6  ;;  %v3358_v5 = vld [vmem:[%s3809_s9 + $0x794] ss:$8 sps:$4 sm:$0xff]   ;;  %v3353_v6 = vld [vmem:[%s3809_s9 + $0x390] ss:$8 sps:$4 sm:$0xff]  }
 0x117   : > { %2339 = vmatprep.subr.bf16.mxu0 %v3274_v7  ;;  %v3356_v7 = vld [vmem:[%s3809_s9 + $0x790] ss:$8 sps:$4 sm:$0xff]  }
 0x119   : > { %2176 = vmatpush1.bf16.msra.mxu1 %v3269_v8  ;;  %v3361_v8 = vld [vmem:[%s3809_s9 + $0x3a4] ss:$8 sps:$4 sm:$0xff]  }
 0x11a   : > { %2340 = vmatpush1.bf16.msra.mxu0 %v3272_v9  ;;  %2177 = vmatprep.subr.bf16.mxu1 %v3277_v10  ;;  %v3364_v9 = vld [vmem:[%s3809_s9 + $0x7a4] ss:$8 sps:$4 sm:$0xff]   ;;  %v3359_v10 = vld [vmem:[%s3809_s9 + $0x3a0] ss:$8 sps:$4 sm:$0xff]  }
 0x11b   : > { %2341 = vmatprep.subr.bf16.mxu0 %v3280_v11  ;;  %v3362_v11 = vld [vmem:[%s3809_s9 + $0x7a0] ss:$8 sps:$4 sm:$0xff]  }
 0x11d   : > { %2178 = vmatpush1.bf16.msra.mxu1 %v3275_v12  ;;  %v3367_v12 = vld [vmem:[%s3809_s9 + $0x3b4] ss:$8 sps:$4 sm:$0xff]  }
 0x11e   : > { %2342 = vmatpush1.bf16.msra.mxu0 %v3278_v13  ;;  %2179 = vmatprep.subr.bf16.mxu1 %v3283_v14  ;;  %v3370_v13 = vld [vmem:[%s3809_s9 + $0x7b4] ss:$8 sps:$4 sm:$0xff]   ;;  %v3365_v14 = vld [vmem:[%s3809_s9 + $0x3b0] ss:$8 sps:$4 sm:$0xff]  }
 0x11f   : > { %2343 = vmatprep.subr.bf16.mxu0 %v3286_v15  ;;  %v3368_v15 = vld [vmem:[%s3809_s9 + $0x7b0] ss:$8 sps:$4 sm:$0xff]  }
 0x121   : > { %2180 = vmatpush1.bf16.msra.mxu1 %v3281_v18  ;;  %v3373_v18 = vld [vmem:[%s3809_s9 + $0x3c4] ss:$8 sps:$4 sm:$0xff]  }
 0x122   : > { %2344 = vmatpush1.bf16.msra.mxu0 %v3284_v19  ;;  %2181 = vmatprep.subr.bf16.mxu1 %v3289_v20  ;;  %v3376_v19 = vld [vmem:[%s3809_s9 + $0x7c4] ss:$8 sps:$4 sm:$0xff]   ;;  %v3371_v20 = vld [vmem:[%s3809_s9 + $0x3c0] ss:$8 sps:$4 sm:$0xff]  }
 0x123   : > { %2345 = vmatprep.subr.bf16.mxu0 %v3292_v21  ;;  %v3374_v21 = vld [vmem:[%s3809_s9 + $0x7c0] ss:$8 sps:$4 sm:$0xff]  }
 0x125   : > { %2182 = vmatpush1.bf16.msra.mxu1 %v3287_v22  ;;  %v3379_v22 = vld [vmem:[%s3809_s9 + $0x3d4] ss:$8 sps:$4 sm:$0xff]  }
 0x126   : > { %2346 = vmatpush1.bf16.msra.mxu0 %v3290_v23  ;;  %2183 = vmatprep.subr.bf16.mxu1 %v3295_v24  ;;  %v3382_v23 = vld [vmem:[%s3809_s9 + $0x7d4] ss:$8 sps:$4 sm:$0xff]   ;;  %v3377_v24 = vld [vmem:[%s3809_s9 + $0x3d0] ss:$8 sps:$4 sm:$0xff]  }
 0x127   : > { %2347 = vmatprep.subr.bf16.mxu0 %v3298_v25  ;;  %v3380_v25 = vld [vmem:[%s3809_s9 + $0x7d0] ss:$8 sps:$4 sm:$0xff]  }
 0x129   : > { %2184 = vmatpush1.bf16.msra.mxu1 %v3293_v31  ;;  %v3383_v31 = vld [vmem:[%s3809_s9 + $0x3e0] ss:$8 sps:$4 sm:$0xff]  }
 0x12a   : > { %2348 = vmatpush1.bf16.msra.mxu0 %v3296_v32  ;;  %2194 = vmatprep.subr.bf16.mxu1 %v3301_v34  ;;  %v3386_v32 = vld [vmem:[%s3809_s9 + $0x7e0] ss:$8 sps:$4 sm:$0xff]   ;;  %v3391_v34 = vld [vmem:[%s3809_s9 + $0x3f4] ss:$8 sps:$4 sm:$0xff]  }
 0x12b   : > { %2358 = vmatprep.subr.bf16.mxu0 %v3304_v16  ;;  %v3394_v16 = vld [vmem:[%s3809_s9 + $0x7f4] ss:$8 sps:$4 sm:$0xff]  }
 0x12c   : > { %2186 = vmatmul.mubr.bf16.vlgmr.msra.gmra.mrb[0].mxu1 %v3970_v28  ;;  %v3311_v28 = vld [vmem:[%s3809_s9 + $0x320] ss:$8 sps:$4 sm:$0xff]  }
 0x12d   : > { %2350 = vmatmul.mubr.bf16.vlgmr.msra.gmra.mrb[0].mxu0 %v3983_v33  ;;  %2195 = vmatpush1.bf16.msra.mxu1 %v3299_v26  ;;  %v3314_v33 = vld [vmem:[%s3809_s9 + $0x720] ss:$8 sps:$4 sm:$0xff]   ;;  %v3389_v26 = vld [vmem:[%s3809_s9 + $0x3f0] ss:$8 sps:$4 sm:$0xff]  }
 0x12e   : > { %2359 = vmatpush1.bf16.msra.mxu0 %v3302_v29  ;;  %2196 = vmatprep.subr.bf16.mxu1 %v3307_v36  ;;  %v3392_v29 = vld [vmem:[%s3809_s9 + $0x7f0] ss:$8 sps:$4 sm:$0xff]   ;;  %v3399_v36 = vld [vmem:[%s3809_s9 + $0x804] ss:$8 sps:$4 sm:$0xff]  }
 0x12f   : > { %2360 = vmatprep.subr.bf16.mxu0 %v3310_v37  ;;  %2226 = vmatprep.mubr.bf16.mxu1 %v570_v38  ;;  %v4125_v37 = vld.sshfl [vmem:[%s3801_s29 + $0x20] sm:$0x33 pattern:$0x76325410]  ;;  %v3397_v38 = vld [vmem:[%s3809_s9 + $0x800] ss:$8 sps:$4 sm:$0xff]  }
 0x130   : > { %2390 = vmatprep.mubr.bf16.mxu0 %v604_v39  ;;  %v612_v39 = vcombine.high %v4125_v37, %v4125_v37 }
 0x131   : > { %2197 = vmatpush1.bf16.msra.mxu1 %v3305_v49  ;;  %v3402_v49 = vld [vmem:[%s3809_s9 + $0x814] ss:$8 sps:$4 sm:$0xff]  }
 0x132   : > { %2361 = vmatpush1.bf16.msra.mxu0 %v3308_v40  ;;  %2198 = vmatprep.subr.bf16.mxu1 %v3313_v41  ;;  %v3400_v40 = vld [vmem:[%s3809_s9 + $0x810] ss:$8 sps:$4 sm:$0xff]   ;;  %v3405_v41 = vld [vmem:[%s3809_s9 + $0x824] ss:$8 sps:$4 sm:$0xff]  }
 0x133   : > { %2362 = vmatprep.subr.bf16.mxu0 %v3316_v42  ;;  %v3403_v42 = vld [vmem:[%s3809_s9 + $0x820] ss:$8 sps:$4 sm:$0xff]  }
 0x135   : > { %2199 = vmatpush1.bf16.msra.mxu1 %v3311_v28  ;;  %v3408_v28 = vld [vmem:[%s3809_s9 + $0x834] ss:$8 sps:$4 sm:$0xff]  }
 0x136   : > { %2363 = vmatpush1.bf16.msra.mxu0 %v3314_v33  ;;  %2200 = vmatprep.subr.bf16.mxu1 %v3319_v43  ;;  %v3406_v33 = vld [vmem:[%s3809_s9 + $0x830] ss:$8 sps:$4 sm:$0xff]   ;;  %v3414_v43 = vld [vmem:[%s3809_s9 + $0x854] ss:$8 sps:$4 sm:$0xff]  }
 0x137   : > { %2364 = vmatprep.subr.bf16.mxu0 %v3322_v44  ;;  %v3412_v44 = vld [vmem:[%s3809_s9 + $0x850] ss:$8 sps:$4 sm:$0xff]  }
 0x139   : > { %2201 = vmatpush1.bf16.msra.mxu1 %v3317_v45  ;;  %v3417_v45 = vld [vmem:[%s3809_s9 + $0x864] ss:$8 sps:$4 sm:$0xff]  }
 0x13a   : > { %2365 = vmatpush1.bf16.msra.mxu0 %v3320_v46  ;;  %2202 = vmatprep.subr.bf16.mxu1 %v3325_v47  ;;  %v3415_v46 = vld [vmem:[%s3809_s9 + $0x860] ss:$8 sps:$4 sm:$0xff]   ;;  %v3420_v47 = vld [vmem:[%s3809_s9 + $0x874] ss:$8 sps:$4 sm:$0xff]  }
 0x13b   : > { %2366 = vmatprep.subr.bf16.mxu0 %v3328_v48  ;;  %v3418_v48 = vld [vmem:[%s3809_s9 + $0x870] ss:$8 sps:$4 sm:$0xff]  }
 0x13d   : > { %2203 = vmatpush1.bf16.msra.mxu1 %v3323_v50  ;;  %v3423_v50 = vld [vmem:[%s3809_s9 + $0x884] ss:$8 sps:$4 sm:$0xff]  }
 0x13e   : > { %2367 = vmatpush1.bf16.msra.mxu0 %v3326_v51  ;;  %2204 = vmatprep.subr.bf16.mxu1 %v3331_v52  ;;  %v3421_v51 = vld [vmem:[%s3809_s9 + $0x880] ss:$8 sps:$4 sm:$0xff]   ;;  %v3426_v52 = vld [vmem:[%s3809_s9 + $0x894] ss:$8 sps:$4 sm:$0xff]  }
 0x13f   : > { %2368 = vmatprep.subr.bf16.mxu0 %v3334_v53  ;;  %v3424_v53 = vld [vmem:[%s3809_s9 + $0x890] ss:$8 sps:$4 sm:$0xff]  }
 0x141   : > { %2205 = vmatpush1.bf16.msra.mxu1 %v3329_v54  ;;  %v3429_v54 = vld [vmem:[%s3809_s9 + $0x8a4] ss:$8 sps:$4 sm:$0xff]  }
 0x142   : > { %2369 = vmatpush1.bf16.msra.mxu0 %v3332_v55  ;;  %2206 = vmatprep.subr.bf16.mxu1 %v3337_v56  ;;  %v3427_v55 = vld [vmem:[%s3809_s9 + $0x8a0] ss:$8 sps:$4 sm:$0xff]   ;;  %v3432_v56 = vld [vmem:[%s3809_s9 + $0x8b4] ss:$8 sps:$4 sm:$0xff]  }
 0x143   : > { %2370 = vmatprep.subr.bf16.mxu0 %v3340_v57  ;;  %v3430_v57 = vld [vmem:[%s3809_s9 + $0x8b0] ss:$8 sps:$4 sm:$0xff]  }
 0x145   : > { %2207 = vmatpush1.bf16.msra.mxu1 %v3335_v58  ;;  %v3435_v58 = vld [vmem:[%s3809_s9 + $0x8c4] ss:$8 sps:$4 sm:$0xff]  }
 0x146   : > { %2371 = vmatpush1.bf16.msra.mxu0 %v3338_v59  ;;  %2208 = vmatprep.subr.bf16.mxu1 %v3343_v60  ;;  %v3433_v59 = vld [vmem:[%s3809_s9 + $0x8c0] ss:$8 sps:$4 sm:$0xff]   ;;  %v3438_v60 = vld [vmem:[%s3809_s9 + $0x8d4] ss:$8 sps:$4 sm:$0xff]  }
 0x147   : > { %2372 = vmatprep.subr.bf16.mxu0 %v3346_v61  ;;  %v3436_v61 = vld [vmem:[%s3809_s9 + $0x8d0] ss:$8 sps:$4 sm:$0xff]  }
 0x149   : > { %2209 = vmatpush1.bf16.msra.mxu1 %v3341_v62  ;;  %v3441_v62 = vld [vmem:[%s3809_s9 + $0x8e4] ss:$8 sps:$4 sm:$0xff]  }
 0x14a   : > { %2373 = vmatpush1.bf16.msra.mxu0 %v3344_v63  ;;  %2210 = vmatprep.subr.bf16.mxu1 %v3349_v0  ;;  %v3439_v63 = vld [vmem:[%s3809_s9 + $0x8e0] ss:$8 sps:$4 sm:$0xff]   ;;  %v3444_v0 = vld [vmem:[%s3809_s9 + $0x8f4] ss:$8 sps:$4 sm:$0xff]  }
 0x14b   : > { %2374 = vmatprep.subr.bf16.mxu0 %v3352_v1  ;;  %v3442_v1 = vld [vmem:[%s3809_s9 + $0x8f0] ss:$8 sps:$4 sm:$0xff]  }
 0x14d   : > { %2211 = vmatpush1.bf16.msra.mxu1 %v3347_v2 }
 0x14e   : > { %2375 = vmatpush1.bf16.msra.mxu0 %v3350_v3  ;;  %2212 = vmatprep.subr.bf16.mxu1 %v3355_v4 }
 0x14f   : > { %2376 = vmatprep.subr.bf16.mxu0 %v3358_v5 }
 0x151   : > { %2213 = vmatpush1.bf16.msra.mxu1 %v3353_v6 }
 0x152   : > { %2377 = vmatpush1.bf16.msra.mxu0 %v3356_v7  ;;  %2214 = vmatprep.subr.bf16.mxu1 %v3361_v8 }
 0x153   : > { %2378 = vmatprep.subr.bf16.mxu0 %v3364_v9 }
 0x155   : > { %2215 = vmatpush1.bf16.msra.mxu1 %v3359_v10 }
 0x156   : > { %2379 = vmatpush1.bf16.msra.mxu0 %v3362_v11  ;;  %2216 = vmatprep.subr.bf16.mxu1 %v3367_v12 }
 0x157   : > { %2380 = vmatprep.subr.bf16.mxu0 %v3370_v13 }
 0x159   : > { %2217 = vmatpush1.bf16.msra.mxu1 %v3365_v14 }
 0x15a   : > { %2381 = vmatpush1.bf16.msra.mxu0 %v3368_v15  ;;  %2218 = vmatprep.subr.bf16.mxu1 %v3373_v18 }
 0x15b   : > { %2382 = vmatprep.subr.bf16.mxu0 %v3376_v19 }
 0x15d   : > { %2219 = vmatpush1.bf16.msra.mxu1 %v3371_v20 }
 0x15e   : > { %2383 = vmatpush1.bf16.msra.mxu0 %v3374_v21  ;;  %2220 = vmatprep.subr.bf16.mxu1 %v3379_v22 }
 0x15f   : > { %2384 = vmatprep.subr.bf16.mxu0 %v3382_v23 }
 0x161   : > { %2221 = vmatpush1.bf16.msra.mxu1 %v3377_v24 }
 0x162   : > { %2385 = vmatpush1.bf16.msra.mxu0 %v3380_v25  ;;  %2222 = vmatprep.subr.bf16.mxu1 %v3385_v27 }
 0x163   : > { %2386 = vmatprep.subr.bf16.mxu0 %v3388_v30 }
 0x165   : > { %2223 = vmatpush1.bf16.msra.mxu1 %v3383_v31 }
 0x166   : > { %2387 = vmatpush1.bf16.msra.mxu0 %v3386_v32  ;;  %2224 = vmatprep.subr.bf16.mxu1 %v3391_v34 }
 0x167   : > { %2388 = vmatprep.subr.bf16.mxu0 %v3394_v16 }
 0x169   : > { %2225 = vmatpush1.bf16.msra.mxu1 %v3389_v26 }
 0x16a   : > { %2389 = vmatpush1.bf16.msra.mxu0 %v3392_v29 }
 0x16b   : > { %2399 = vmatprep.subr.bf16.mxu0 %v3399_v36  ;;  %v2469_v36 = vstv %s2465_s22 }
 0x16c   : > { %2227 = vmatmul.mubr.bf16.vlgmr.msra.gmra.mrb[0].mxu1 %v4050_v17  ;;  %v3411_v17 = vld [vmem:[%s3809_s9 + $0x844] ss:$8 sps:$4 sm:$0xff]  }
 0x16d   : > { %2391 = vmatmul.mubr.bf16.vlgmr.msra.gmra.mrb[0].mxu0 %v4053_v35  ;;  %v3409_v35 = vld [vmem:[%s3809_s9 + $0x840] ss:$8 sps:$4 sm:$0xff]  }
 0x16e   : > { %2400 = vmatpush1.bf16.msra.mxu0 %v3397_v38  ;;  %2431 = vmatprep.mubr.bf16.mxu0 %v612_v39  ;;  %v2473_v39 = vstv %s2901_s11 }
 0x16f   : > { %2401 = vmatprep.subr.bf16.mxu0 %v3402_v49 }
 0x172   : > { %2402 = vmatpush1.bf16.msra.mxu0 %v3400_v40 }
 0x173   : > { %2403 = vmatprep.subr.bf16.mxu0 %v3405_v41 }
 0x176   : > { %2404 = vmatpush1.bf16.msra.mxu0 %v3403_v42 }
 0x177   : > { %2405 = vmatprep.subr.bf16.mxu0 %v3408_v28 }
 0x17a   : > { %2406 = vmatpush1.bf16.msra.mxu0 %v3406_v33 }
 0x17b   : > { %2407 = vmatprep.subr.bf16.mxu0 %v3411_v17 }
 0x17e   : > { %2408 = vmatpush1.bf16.msra.mxu0 %v3409_v35 }
 0x17f   : > { %2409 = vmatprep.subr.bf16.mxu0 %v3414_v43 }
 0x182   : > { %2410 = vmatpush1.bf16.msra.mxu0 %v3412_v44 }
 0x183   : > { %2411 = vmatprep.subr.bf16.mxu0 %v3417_v45 }
 0x186   : > { %2412 = vmatpush1.bf16.msra.mxu0 %v3415_v46 }
 0x187   : > { %2413 = vmatprep.subr.bf16.mxu0 %v3420_v47 }
 0x18a   : > { %2414 = vmatpush1.bf16.msra.mxu0 %v3418_v48 }
 0x18b   : > { %2415 = vmatprep.subr.bf16.mxu0 %v3423_v50 }
 0x18e   : > { %2416 = vmatpush1.bf16.msra.mxu0 %v3421_v51 }
 0x18f   : > { %2417 = vmatprep.subr.bf16.mxu0 %v3426_v52 }
 0x192   : > { %2418 = vmatpush1.bf16.msra.mxu0 %v3424_v53 }
 0x193   : > { %2419 = vmatprep.subr.bf16.mxu0 %v3429_v54 }
 0x196   : > { %2420 = vmatpush1.bf16.msra.mxu0 %v3427_v55 }
 0x197   : > { %2421 = vmatprep.subr.bf16.mxu0 %v3432_v56 }
 0x19a   : > { %2422 = vmatpush1.bf16.msra.mxu0 %v3430_v57 }
 0x19b   : > { %2423 = vmatprep.subr.bf16.mxu0 %v3435_v58 }
 0x19e   : > { %2424 = vmatpush1.bf16.msra.mxu0 %v3433_v59 }
 0x19f   : > { %2425 = vmatprep.subr.bf16.mxu0 %v3438_v60 }
 0x1a2   : > { %2426 = vmatpush1.bf16.msra.mxu0 %v3436_v61 }
 0x1a3   : > { %2427 = vmatprep.subr.bf16.mxu0 %v3441_v62 }
 0x1a6   : > { %2428 = vmatpush1.bf16.msra.mxu0 %v3439_v63 }
 0x1a7   : > { %2429 = vmatprep.subr.bf16.mxu0 %v3444_v0 }
 0x1aa   : > { %2430 = vmatpush1.bf16.msra.mxu0 %v3442_v1 }
 0x1ad   : > { %2432 = vmatmul.mubr.bf16.vlgmr.msra.gmra.mrb[0].mxu0 %v4125_v37 }
 0x23f   : > { %v2228_v2 = vpop.f32.mrb[0].mxu1 }
 0x240   : > { %v2230_v3 = vpop.f32.mrb[1].mxu1 }
 0x241   : > { %v2232_v4 = vpop.f32.mrb[2].mxu1 }
 0x242   : > { %v2233_v5 = vpop.f32.mrb[3].mxu1 }
 0x280   : > { %v2433_v6 = vpop.f32.mrb[0].mxu0 }
 0x281   : > { %v2908_v7 = vadd.f32 %v2433_v6, %v2228_v2  ;;  %v2435_v8 = vpop.f32.mrb[1].mxu0 }
 0x282   : > { %v2909_v9 = vadd.f32 %v2435_v8, %v2230_v3  ;;  %v2437_v10 = vpop.f32.mrb[2].mxu0 }
 0x283   : > { %v2438_v11 = vpop.f32.mrb[3].mxu0  ;;  %v2441_v12 = vsel %vm2440_vm0, %v2908_v7, 0.0 }
 0x284   : > { %v2442_v13 = vsel %vm2440_vm0, %v2909_v9, 0.0 }
 0x285   : > { %v2443_v14 = vadd.f32 %v2442_v13, %v2441_v12 }
 0x287   : > { %2444 = vadd.xlane.f32.xlu0 %v2443_v14 }
 0x314   : > { %v2445_v15 = vpop.xlane.xlu0 %2444 }
 0x315   : > { %v2447_v18 = vmul.f32 0.00390625, %v2445_v15 }
 0x317   : > { %v2448_v19 = vsub.f32 %v2908_v7, %v2447_v18  ;;  %v2449_v20 = vsub.f32 %v2909_v9, %v2447_v18 }
 0x319   : > { %v2450_v21 = vmul.f32 %v2448_v19, %v2448_v19  ;;  %v2451_v22 = vmul.f32 %v2449_v20, %v2449_v20 }
 0x31b   : > { %v2452_v23 = vsel %vm2440_vm0, %v2450_v21, 0.0  ;;  %v2453_v24 = vsel %vm2440_vm0, %v2451_v22, 0.0 }
 0x31c   : > { %v2454_v25 = vadd.f32 %v2453_v24, %v2452_v23 }
 0x31e   : > { %2455 = vadd.xlane.f32.xlu0 %v2454_v25 }
 0x3ab   : > { %v2456_v27 = vpop.xlane.xlu0 %2455 }
 0x3ac   : > { %v2457_v30 = vmul.f32 0.003921569, %v2456_v27 }
 0x3ae   : > { %3445 = vrsqrt.f32 %v2457_v30  ;;  %vm2460_vm1 = vcmp.eq.f32.partialorder %v2457_v30, inf  ;;  %v2463_v34 = vand.u32 2147483648, %v2457_v30  ;;  %vm2462_vm2 = vcmp.eq.f32.partialorder %v2457_v30, 0.0 }
 0x3b8   : > { %v3446_v31 = vpop.eup %3445 }
 0x3b9   : > { %v2459_v32 = vmul.f32 %v3446_v31, %v2457_v30 }
 0x3bb   : > { %v2461_v16 = vsel %vm2460_vm1, %v2457_v30, %v2459_v32 }
 0x3bc   : > { %v2464_v26 = vsel %vm2462_vm2, %v2463_v34, %v2461_v16 }
 0x3bd   : > { %v2467_v29 = vadd.f32 1e-08, %v2464_v26 }
 0x3bf   : > { %3447 = vrcp.f32 %v2467_v29 }
 0x3c9   : > { %v3448_v37 = vpop.eup %3447 }
 0x3ca   : > { %v2470_v38 = vmul.f32 %v3448_v37, %v2469_v36 }
 0x3cc   : > { %v2471_v49 = vmul.f32 %v2470_v38, %v2448_v19  ;;  %v2472_v40 = vmul.f32 %v2470_v38, %v2449_v20 }
 0x3ce   : > { %v2474_v41 = vadd.f32 %v2473_v39, %v2471_v49  ;;  %v2475_v42 = vadd.f32 %v2473_v39, %v2472_v40 }
 0x3d0   : > { %3449 = vtanh.f32 %v2474_v41 }
 0x3d1   : > { %3451 = vtanh.f32 %v2475_v42 }
 0x3da   : > { %v3450_v28 = vpop.eup %3449 }
 0x3db   : > { %v3452_v33 = vpop.eup %3451 }
 0x3dc   : > { %v2480_v17 = vcombine.low %v3450_v28, %v3452_v33 }
 0x3de   : > { %2482 = vst [vmem:[%s238_s20] sm:$0xff] %v2480_v17 }
 0x3df   : > { %3539 = shalt.err (!%p3536_p13)
}
 0x3e0   : > { %s3540_s30 = scalar_lea.hbm %s4172_s28, 128  ;;  %s3544_s26 = scalar_lea.hbm %s4219_s3, 256 }
 0x3e1   : > { %p3541_p9 = scmp.ne.s32.totalorder %s4172_s28, %s3540_s30  ;;  %p3545_p10 = scmp.lt.u32.totalorder %s4172_s28, %s4219_s3 }
 0x3e2   : > { %p3546_p8 = scmp.lt.u32.totalorder %s3544_s26, %s3540_s30  ;;  %p3548_p11 = scmp.lt.u32.totalorder %s3540_s30, %s4172_s28 }
 0x3e3   : > { %p3542_p0 = pnand %p3541_p9, %p4232_p3 }
 0x3e4   : > { %p3547_p7 = por %p3546_p8, %p3545_p10 }
 0x3e5   : > { %p3543_p6 = pneg %p3542_p0 }
 0x3e6   : > { %p3549_p12 = por %p3548_p11, %p3547_p7 }
 0x3e8   : > { %p3550_p1 = pnand %p3549_p12, %p3543_p6 }
 0x3ea   : > { %3553 = shalt.err (!%p3550_p1)
}
 0x3eb   : > { %2952 = dma.vmem_to_hbm [thread:$0]  (%p4232_p3), %s4174_s4, 128, %s4172_s28, %s2484_s10  }
 0x3ec PF: > { %s2510_s11 = sand.u32 1, %s3588_s12   ;;  %p4233_p4 = scmp.ne.s32.totalorder %s4225_s24, 0 }
 0x3ed   : > { %p4234_p2 = scmp.ge.s32.totalorder %s3600_s15, 2  ;;  %s2511_s27 = scalar_lea.sflag [#allocation4], %s2510_s11 }
 0x3ef   : > { %p2966_p5 = pnand %p4234_p2, %p4233_p4 }
 0x3f1   : > { %3583 = dma.done.wait (!%p2966_p5), %s2511_s27, 128  }
 0x3f2   : > { %3585 = vsyncadd (!%p2966_p5), %s2511_s27, 4294967168  ;;  %p20_p13 = scmp.ge.s32.totalorder %s3654_s18, 4   ;;  %s4235_s12 = smov %s3592_s13 }
 0x3f3   : > { %s4236_s13 = smov %s3596_s14  ;;  %s4237_s14 = smov %s3666_s21 }
 0x3f4   : > { %s4238_s15 = smov %s3654_s18  ;;  %22 = sbr.rel (!%p20_p13) target bundleno = 8 (0x8), region = 95 }
 0x3fb   :  { %2516 = vsyncpa [#allocation3], 1 }
 0x3fc   :  { %2518 = vsyncpa [#allocation3 + $0x1], 1 }
 0x3fd   :  { %2519 = vsyncpa [#allocation8], 1 }
 0x3fe   :  { %2521 = vsyncpa [#allocation8 + $0x1], 1 }
 0x3ff   :  { %2522 = vsyncpa [#allocation4], 1 }
 0x400   :  { %2524 = vsyncpa [#allocation4 + $0x1], 1 }
 0x401   :  { %2525 = vsyncpa [#allocation5], 1 }
 0x402   :  { %2527 = vsyncpa [#allocation5 + $0x1], 1 }

</bundles_post_ra>
